<compile_context>
chip_gen: v5e
topology: v5e:2x2
jax: 0.10.0
libtpu: 0.0.40
codegen_flags: <defaults>
</compile_context>

<pallas_src>
import functools

import jax
import jax.numpy as jnp
from jax import lax
from jax.experimental import pallas as pl
from jax.experimental.pallas import tpu as pltpu

FILTER = 7
PAD = 3
LANES = 128
SUBLANES = 8


def _round_up(x, m):
    return (x + m - 1) // m * m


def _conv_attn_chunk(pf_ref, w_ref, m_ref, *, W, h0, hc, tap_base):
    """7x7 'same' conv (2->1 ch) + sigmoid for flat output positions [h0, h0+hc).

    pf_ref: (2, pf_len) flat row-padded (sum, max) planes.
    w_ref:  (2, 128) conv weights (first 49 lanes; avg row pre-scaled by 1/C).
    m_ref:  (7, HW) per-dx horizontal-validity masks (f32 0/1).
    Returns the (1, hc) float32 attention chunk.
    """
    acc0 = jnp.zeros((2, hc), jnp.float32)
    acc1 = jnp.zeros((2, hc), jnp.float32)
    for dx in range(FILTER):
        # Two independent dy accumulators break the 7-deep dependent add chain.
        p0 = jnp.zeros((2, hc), jnp.float32)
        p1 = jnp.zeros((2, hc), jnp.float32)
        for dy in range(FILTER):
            k = dy * FILTER + dx
            s = tap_base + dy * W + dx + h0
            tap = pf_ref[:, s:s + hc]                 # (2, hc) Ref slice (no pf value)
            wcol = w_ref[:, k:k + 1]                  # (2, 1): fused avg/max weights
            term = tap * wcol
            if dy % 2 == 0:
                p0 = p0 + term
            else:
                p1 = p1 + term
        part = p0 + p1
        if dx != PAD:  # dx == PAD -> mask is all ones, skip the multiply
            part = part * m_ref[dx:dx + 1, h0:h0 + hc]
        if dx % 2 == 0:
            acc0 = acc0 + part
        else:
            acc1 = acc1 + part
    conv = jnp.sum(acc0 + acc1, axis=0, keepdims=True)   # fuse the 2 sublanes once
    return jax.nn.sigmoid(conv)                           # (1, hc)


# ----------------------------------------------------------------------------
# Fused single-pass kernel (whole (C, HW) block fits in VMEM).
# ----------------------------------------------------------------------------
def _fused_kernel(x_ref, w_ref, m_ref, o_ref, pf_ref, *,
                  C, W, HW, c_chunk, hw_chunk, data_start, pf_len):
    tap_base = data_start - (PAD * W + PAD)
    n_c_full = C // c_chunk
    c_rem = C % c_chunk

    # Zero borders of the flat row-padded scratch (vertical conv padding).
    pf_ref[:, 0:data_start] = jnp.zeros((2, data_start), jnp.float32)
    pf_ref[:, data_start + HW:pf_len] = jnp.zeros(
        (2, pf_len - data_start - HW), jnp.float32)

    # --- Phase 1+2: channel sum / max, streamed in (c_chunk, hw_chunk) tiles,
    #     written straight into the padded scratch planes.
    for h0 in range(0, HW, hw_chunk):
        hc = min(hw_chunk, HW - h0)

        def red_body(ci, carry, h0=h0, hc=hc):
            s_acc, m_acc = carry
            c0 = pl.multiple_of(ci * c_chunk, c_chunk)
            blk = x_ref[pl.ds(c0, c_chunk), pl.ds(h0, hc)].astype(jnp.float32)
            return (s_acc + jnp.sum(blk, axis=0, keepdims=True),
                    jnp.maximum(m_acc, jnp.max(blk, axis=0, keepdims=True)))

        s_acc = jnp.zeros((1, hc), jnp.float32)
        m_acc = jnp.full((1, hc), -jnp.inf, jnp.float32)
        if n_c_full > 0:
            s_acc, m_acc = lax.fori_loop(0, n_c_full, red_body, (s_acc, m_acc))
        if c_rem:
            blk = x_ref[C - c_rem:C, h0:h0 + hc].astype(jnp.float32)
            s_acc = s_acc + jnp.sum(blk, axis=0, keepdims=True)
            m_acc = jnp.maximum(m_acc, jnp.max(blk, axis=0, keepdims=True))
        pf_ref[0:1, data_start + h0:data_start + h0 + hc] = s_acc
        pf_ref[1:2, data_start + h0:data_start + h0 + hc] = m_acc

    # --- Phase 3+4: conv + sigmoid per hw chunk, then attention multiply
    #     streamed over C (broadcast hoisted out of the fori loop).
    for h0 in range(0, HW, hw_chunk):
        hc = min(hw_chunk, HW - h0)
        attn = _conv_attn_chunk(pf_ref, w_ref, m_ref,
                                W=W, h0=h0, hc=hc, tap_base=tap_base)
        # Keep the multiply in the input dtype (bf16 stays bf16 on v6e/v7x;
        # f32 inputs are unchanged).  Note: v5e has no bf16 VALU.
        attn_x = attn.astype(x_ref.dtype)
        if n_c_full > 0:
            attn_b = pl.broadcast_to(attn_x, (c_chunk, hc))   # hoisted broadcast

            def mul_body(ci, carry, h0=h0, hc=hc, attn_b=attn_b):
                c0 = pl.multiple_of(ci * c_chunk, c_chunk)
                blk = x_ref[pl.ds(c0, c_chunk), pl.ds(h0, hc)]
                o_ref[pl.ds(c0, c_chunk), pl.ds(h0, hc)] = (
                    blk * attn_b).astype(o_ref.dtype)
                return carry

            lax.fori_loop(0, n_c_full, mul_body, 0)
        if c_rem:
            blk = x_ref[C - c_rem:C, h0:h0 + hc]
            o_ref[C - c_rem:C, h0:h0 + hc] = (blk * attn_x).astype(o_ref.dtype)


# ----------------------------------------------------------------------------
# C-tiled two-pass fallback (whole (C, HW) block does not fit in VMEM).
# ----------------------------------------------------------------------------
def _attn_kernel(x_ref, w_ref, m_ref, attn_ref, pf_ref, *,
                 C, c_blk, W, HW, hw_chunk, data_start, pf_len):
    ci = pl.program_id(1)
    tap_base = data_start - (PAD * W + PAD)

    @pl.when(ci == 0)
    def _init():
        pf_ref[:, 0:data_start] = jnp.zeros((2, data_start), jnp.float32)
        pf_ref[:, data_start + HW:pf_len] = jnp.zeros(
            (2, pf_len - data_start - HW), jnp.float32)
        for h0 in range(0, HW, hw_chunk):
            hc = min(hw_chunk, HW - h0)
            sl = slice(data_start + h0, data_start + h0 + hc)
            pf_ref[0:1, sl] = jnp.zeros((1, hc), jnp.float32)
            pf_ref[1:2, sl] = jnp.full((1, hc), -jnp.inf, jnp.float32)

    # Rows of this C block that are real channels (last block may be ragged).
    row_ok = (lax.broadcasted_iota(jnp.int32, (c_blk, 1), 0) + ci * c_blk) < C

    for h0 in range(0, HW, hw_chunk):
        hc = min(hw_chunk, HW - h0)
        sl = slice(data_start + h0, data_start + h0 + hc)
        blk = x_ref[:, h0:h0 + hc].astype(jnp.float32)
        bs = jnp.where(row_ok, blk, 0.0)
        bm = jnp.where(row_ok, blk, -jnp.inf)
        pf_ref[0:1, sl] = pf_ref[0:1, sl] + jnp.sum(bs, axis=0, keepdims=True)
        pf_ref[1:2, sl] = jnp.maximum(pf_ref[1:2, sl],
                                      jnp.max(bm, axis=0, keepdims=True))

    @pl.when(ci == pl.num_programs(1) - 1)
    def _finish():
        for h0 in range(0, HW, hw_chunk):
            hc = min(hw_chunk, HW - h0)
            attn_ref[0:1, h0:h0 + hc] = _conv_attn_chunk(
                pf_ref, w_ref, m_ref, W=W, h0=h0, hc=hc, tap_base=tap_base)


def _mul_kernel(x_ref, attn_ref, o_ref, *, HW, hw_chunk):
    for h0 in range(0, HW, hw_chunk):
        hc = min(hw_chunk, HW - h0)
        a = attn_ref[0:1, h0:h0 + hc].astype(x_ref.dtype)
        o_ref[:, h0:h0 + hc] = (x_ref[:, h0:h0 + hc] * a).astype(o_ref.dtype)


# ----------------------------------------------------------------------------
# Wrapper
# ----------------------------------------------------------------------------
def spatial_focus_module(x, w):
    """x: (B, C, H, W); w: (2, 7, 7) conv weight (in-ch, kh, kw) -> (B, C, H, W)."""
    B, C, H, W = x.shape
    HW = H * W
    data_start = int(_round_up(PAD * W + PAD, LANES))          # 128-aligned interior
    pf_len = int(_round_up(data_start + HW + PAD * W + PAD, LANES))

    # Host-side precompute: 1/C folded into the avg-channel weights; weights
    # padded to 128 lanes; per-dx horizontal masks for the flat conv.
    w_scaled = jnp.concatenate(
        [(w[0] / float(C)).reshape(1, FILTER * FILTER),
         w[1].reshape(1, FILTER * FILTER)], axis=0).astype(jnp.float32)
    w_pad = jnp.zeros((2, LANES), jnp.float32).at[:, :FILTER * FILTER].set(w_scaled)
    xcoord = jnp.arange(HW, dtype=jnp.int32) % W
    masks = jnp.stack(
        [((xcoord >= PAD - dx) & (xcoord < W + PAD - dx)).astype(jnp.float32)
         for dx in range(FILTER)], axis=0)                     # (7, HW)

    x2 = x.reshape(B, C, HW)                                   # lane-dense layout

    # Chunk sizes: bounded live tiles (hw_chunk lanes, multiple-of-8 C chunks).
    hw_chunk = int(min(HW, 1024))
    c_chunk = int(min(max(SUBLANES, (16384 // hw_chunk) // SUBLANES * SUBLANES),
                      _round_up(C, SUBLANES)))

    # Per-chip VMEM budget (v5e/v6e: 128 MiB, v7x: 64 MiB per TensorCore).
    try:
        vmem_cap = int(pltpu.get_tpu_info().vmem_capacity_bytes)
    except Exception:  # not queryable -> conservative (v7x per-core) default
        vmem_cap = 64 << 20
    vmem_budget = vmem_cap - (8 << 20)                         # Mosaic headroom

    dt_bytes = x.dtype.itemsize
    block_bytes = C * HW * dt_bytes
    resident_bytes = 2 * FILTER * HW * 4 + 2 * 2 * LANES * 4 + 2 * pf_len * 4
    fused_need = 4 * block_bytes + resident_bytes + (2 << 20)

    if fused_need <= vmem_budget:
        # ---------------- fused single-pass path ----------------
        kernel = functools.partial(
            _fused_kernel, C=C, W=W, HW=HW, c_chunk=c_chunk,
            hw_chunk=hw_chunk, data_start=data_start, pf_len=pf_len)
        out2 = pl.pallas_call(
            kernel,
            out_shape=jax.ShapeDtypeStruct((B, C, HW), x.dtype),
            grid_spec=pltpu.PrefetchScalarGridSpec(
                num_scalar_prefetch=0,
                grid=(B,),
                in_specs=[
                    pl.BlockSpec((None, C, HW), lambda b: (b, 0, 0)),
                    pl.BlockSpec((2, LANES), lambda b: (0, 0)),
                    pl.BlockSpec((FILTER, HW), lambda b: (0, 0)),
                ],
                out_specs=pl.BlockSpec((None, C, HW), lambda b: (b, 0, 0)),
                scratch_shapes=[pltpu.VMEM((2, pf_len), jnp.float32)],
            ),
            compiler_params=pltpu.CompilerParams(
                dimension_semantics=("parallel",),
                vmem_limit_bytes=int(min(max(fused_need, 16 << 20), vmem_budget)),
            ),
        )(x2, w_pad, masks)
        return out2.reshape(B, C, H, W)

    # ---------------- C-tiled two-pass fallback ----------------
    avail = max(vmem_budget - resident_bytes - 4 * HW * 4 - (2 << 20),
                4 * SUBLANES * HW * dt_bytes)
    c_blk = (avail // (4 * HW * dt_bytes)) // SUBLANES * SUBLANES
    c_blk = int(max(SUBLANES, min(c_blk, _round_up(C, SUBLANES), 16)))
    n_cblk = -(-C // c_blk)
    vmem_limit_tiled = int(vmem_budget)

    attn_kernel = functools.partial(
        _attn_kernel, C=C, c_blk=c_blk, W=W, HW=HW,
        hw_chunk=hw_chunk, data_start=data_start, pf_len=pf_len)
    attn = pl.pallas_call(
        attn_kernel,
        out_shape=jax.ShapeDtypeStruct((B, 1, HW), jnp.float32),
        grid_spec=pltpu.PrefetchScalarGridSpec(
            num_scalar_prefetch=0,
            grid=(B, n_cblk),
            in_specs=[
                pl.BlockSpec((None, c_blk, HW), lambda b, ci: (b, ci, 0)),
                pl.BlockSpec((2, LANES), lambda b, ci: (0, 0)),
                pl.BlockSpec((FILTER, HW), lambda b, ci: (0, 0)),
            ],
            out_specs=pl.BlockSpec((None, 1, HW), lambda b, ci: (b, 0, 0)),
            scratch_shapes=[pltpu.VMEM((2, pf_len), jnp.float32)],
        ),
        compiler_params=pltpu.CompilerParams(
            dimension_semantics=("parallel", "arbitrary"),
            vmem_limit_bytes=vmem_limit_tiled,
        ),
    )(x2, w_pad, masks)

    mul_kernel = functools.partial(_mul_kernel, HW=HW, hw_chunk=hw_chunk)
    out2 = pl.pallas_call(
        mul_kernel,
        out_shape=jax.ShapeDtypeStruct((B, C, HW), x.dtype),
        grid_spec=pltpu.PrefetchScalarGridSpec(
            num_scalar_prefetch=0,
            grid=(B, n_cblk),
            in_specs=[
                pl.BlockSpec((None, c_blk, HW), lambda b, ci: (b, ci, 0)),
                pl.BlockSpec((None, 1, HW), lambda b, ci: (b, 0, 0)),
            ],
            out_specs=pl.BlockSpec((None, c_blk, HW), lambda b, ci: (b, ci, 0)),
        ),
        compiler_params=pltpu.CompilerParams(
            dimension_semantics=("parallel", "parallel"),
            vmem_limit_bytes=vmem_limit_tiled,
        ),
    )(x2, attn)
    return out2.reshape(B, C, H, W)


def _reference(x, w):
    """Pure-JAX reference mirroring the PyTorch forward."""
    avg = jnp.mean(x, axis=1, keepdims=True)          # (B,1,H,W)
    mx = jnp.max(x, axis=1, keepdims=True)            # (B,1,H,W)
    combined = jnp.concatenate([avg, mx], axis=1)     # (B,2,H,W)
    wk = w[None]                                      # (1,2,7,7) OIHW
    filt = jax.lax.conv_general_dilated(
        combined, wk, window_strides=(1, 1),
        padding=((PAD, PAD), (PAD, PAD)),
        dimension_numbers=("NCHW", "OIHW", "NCHW"))
    attn = jax.nn.sigmoid(filt)                       # (B,1,H,W)
    return attn * x


if __name__ == "__main__":
    key = jax.random.PRNGKey(0)
    kx, kw = jax.random.split(key)

    B, C, H, W = 2, 4, 16, 16
    x = jax.random.normal(kx, (B, C, H, W), dtype=jnp.float32)

    # Deterministic conv weight init (PyTorch-style kaiming-uniform bound):
    # fan_in = 2 * 7 * 7 = 98, bound = 1 / sqrt(98)
    bound = 1.0 / jnp.sqrt(2.0 * FILTER * FILTER)
    w = jax.random.uniform(kw, (2, FILTER, FILTER), dtype=jnp.float32,
                           minval=-bound, maxval=bound)

    out = spatial_focus_module(x, w)
    out = jax.block_until_ready(out)

    ref = _reference(x, w)
    assert out.shape == (B, C, H, W)
    assert jnp.allclose(out, ref, atol=1e-5, rtol=1e-5), "mismatch vs reference"

    print("KERNEL_OK")
</pallas_src>

<mosaic_0001>
module attributes {stable_mosaic.version = 11 : i64} {
  func.func @_fused_kernel(%arg0: i32, %arg1: memref<1x4x256xf32, #tpu.memory_space<vmem>>, %arg2: memref<2x128xf32, #tpu.memory_space<vmem>>, %arg3: memref<7x256xf32, #tpu.memory_space<vmem>>, %arg4: memref<1x4x256xf32, #tpu.memory_space<vmem>>, %arg5: memref<2x512xf32, #tpu.memory_space<vmem>>) attributes {dimension_semantics = [#tpu.dimension_semantics<parallel>], iteration_bounds = array<i64: 2>, scalar_prefetch = 0 : i64, scratch_operands = 1 : i64, tpu.core_type = #tpu.core_type<tc>, window_params = [{transform_indices = @transform_0, window_bounds = array<i64: 1, 4, 256>}, {pipeline_mode = #tpu.pipeline_mode<synchronous>, transform_indices = @transform_1, window_bounds = array<i64: 2, 128>}, {pipeline_mode = #tpu.pipeline_mode<synchronous>, transform_indices = @transform_2, window_bounds = array<i64: 7, 256>}, {transform_indices = @transform_3, window_bounds = array<i64: 1, 4, 256>}]} {
    %cst = arith.constant 0.000000e+00 : f32
    %0 = vector.broadcast %cst : f32 to vector<2x128xf32>
    %c0 = arith.constant 0 : index
    %c0_0 = arith.constant 0 : index
    %1 = vector.load %arg5[%c0, %c0_0] : memref<2x512xf32, #tpu.memory_space<vmem>>, vector<2x128xf32>
    tpu.vector_store %arg5[%c0, %c0_0], %0 {strides = array<i32>} : memref<2x512xf32, #tpu.memory_space<vmem>>, vector<2x128xf32>,
    %cst_1 = arith.constant 0.000000e+00 : f32
    %2 = vector.broadcast %cst_1 : f32 to vector<2x128xf32>
    %c0_2 = arith.constant 0 : index
    %c384 = arith.constant 384 : index
    %3 = vector.load %arg5[%c0_2, %c384] : memref<2x512xf32, #tpu.memory_space<vmem>>, vector<2x128xf32>
    tpu.vector_store %arg5[%c0_2, %c384], %2 {strides = array<i32>} : memref<2x512xf32, #tpu.memory_space<vmem>>, vector<2x128xf32>,
    %cst_3 = arith.constant 0.000000e+00 : f32
    %4 = vector.broadcast %cst_3 : f32 to vector<1x256xf32>
    %cst_4 = arith.constant 0xFF800000 : f32
    %5 = vector.broadcast %cst_4 : f32 to vector<1x256xf32>
    %c0_5 = arith.constant 0 : index
    %c0_6 = arith.constant 0 : index
    %c0_7 = arith.constant 0 : index
    %6 = vector.load %arg1[%c0_5, %c0_6, %c0_7] : memref<1x4x256xf32, #tpu.memory_space<vmem>>, vector<1x4x256xf32>
    %7 = vector.shape_cast %6 : vector<1x4x256xf32> to vector<4x256xf32>
    %cst_8 = arith.constant dense<0.000000e+00> : vector<256xf32>
    %8 = vector.multi_reduction <add>, %7, %cst_8 [0] : vector<4x256xf32> to vector<256xf32>
    %9 = vector.shape_cast %8 : vector<256xf32> to vector<1x256xf32>
    %10 = arith.addf %4, %9 : vector<1x256xf32>
    %cst_9 = arith.constant dense<0xFF800000> : vector<256xf32>
    %11 = vector.multi_reduction <maximumf>, %7, %cst_9 [0] : vector<4x256xf32> to vector<256xf32>
    %12 = vector.shape_cast %11 : vector<256xf32> to vector<1x256xf32>
    %13 = arith.maximumf %5, %12 : vector<1x256xf32>
    %c0_10 = arith.constant 0 : index
    %c128 = arith.constant 128 : index
    %14 = vector.load %arg5[%c0_10, %c128] : memref<2x512xf32, #tpu.memory_space<vmem>>, vector<1x256xf32>
    tpu.vector_store %arg5[%c0_10, %c128], %10 {strides = array<i32>} : memref<2x512xf32, #tpu.memory_space<vmem>>, vector<1x256xf32>,
    %c1 = arith.constant 1 : index
    %c128_11 = arith.constant 128 : index
    %15 = vector.load %arg5[%c1, %c128_11] : memref<2x512xf32, #tpu.memory_space<vmem>>, vector<1x256xf32>
    tpu.vector_store %arg5[%c1, %c128_11], %13 {strides = array<i32>} : memref<2x512xf32, #tpu.memory_space<vmem>>, vector<1x256xf32>,
    %cst_12 = arith.constant 0.000000e+00 : f32
    %16 = vector.broadcast %cst_12 : f32 to vector<2x256xf32>
    %cst_13 = arith.constant 0.000000e+00 : f32
    %17 = vector.broadcast %cst_13 : f32 to vector<2x256xf32>
    %cst_14 = arith.constant 0.000000e+00 : f32
    %18 = vector.broadcast %cst_14 : f32 to vector<2x256xf32>
    %cst_15 = arith.constant 0.000000e+00 : f32
    %19 = vector.broadcast %cst_15 : f32 to vector<2x256xf32>
    %c0_16 = arith.constant 0 : index
    %c77 = arith.constant 77 : index
    %20 = vector.load %arg5[%c0_16, %c77] : memref<2x512xf32, #tpu.memory_space<vmem>>, vector<2x256xf32>
    %c0_17 = arith.constant 0 : index
    %c0_18 = arith.constant 0 : index
    %21 = vector.load %arg2[%c0_17, %c0_18] : memref<2x128xf32, #tpu.memory_space<vmem>>, vector<2x1xf32>
    %22 = vector.broadcast %21 : vector<2x1xf32> to vector<2x256xf32>
    %23 = arith.mulf %20, %22 : vector<2x256xf32>
    %24 = arith.addf %18, %23 : vector<2x256xf32>
    %c0_19 = arith.constant 0 : index
    %c93 = arith.constant 93 : index
    %25 = vector.load %arg5[%c0_19, %c93] : memref<2x512xf32, #tpu.memory_space<vmem>>, vector<2x256xf32>
    %c0_20 = arith.constant 0 : index
    %c7 = arith.constant 7 : index
    %26 = vector.load %arg2[%c0_20, %c7] : memref<2x128xf32, #tpu.memory_space<vmem>>, vector<2x1xf32>
    %27 = vector.broadcast %26 : vector<2x1xf32> to vector<2x256xf32>
    %28 = arith.mulf %25, %27 : vector<2x256xf32>
    %29 = arith.addf %19, %28 : vector<2x256xf32>
    %c0_21 = arith.constant 0 : index
    %c109 = arith.constant 109 : index
    %30 = vector.load %arg5[%c0_21, %c109] : memref<2x512xf32, #tpu.memory_space<vmem>>, vector<2x256xf32>
    %c0_22 = arith.constant 0 : index
    %c14 = arith.constant 14 : index
    %31 = vector.load %arg2[%c0_22, %c14] : memref<2x128xf32, #tpu.memory_space<vmem>>, vector<2x1xf32>
    %32 = vector.broadcast %31 : vector<2x1xf32> to vector<2x256xf32>
    %33 = arith.mulf %30, %32 : vector<2x256xf32>
    %34 = arith.addf %24, %33 : vector<2x256xf32>
    %c0_23 = arith.constant 0 : index
    %c125 = arith.constant 125 : index
    %35 = vector.load %arg5[%c0_23, %c125] : memref<2x512xf32, #tpu.memory_space<vmem>>, vector<2x256xf32>
    %c0_24 = arith.constant 0 : index
    %c21 = arith.constant 21 : index
    %36 = vector.load %arg2[%c0_24, %c21] : memref<2x128xf32, #tpu.memory_space<vmem>>, vector<2x1xf32>
    %37 = vector.broadcast %36 : vector<2x1xf32> to vector<2x256xf32>
    %38 = arith.mulf %35, %37 : vector<2x256xf32>
    %39 = arith.addf %29, %38 : vector<2x256xf32>
    %c0_25 = arith.constant 0 : index
    %c141 = arith.constant 141 : index
    %40 = vector.load %arg5[%c0_25, %c141] : memref<2x512xf32, #tpu.memory_space<vmem>>, vector<2x256xf32>
    %c0_26 = arith.constant 0 : index
    %c28 = arith.constant 28 : index
    %41 = vector.load %arg2[%c0_26, %c28] : memref<2x128xf32, #tpu.memory_space<vmem>>, vector<2x1xf32>
    %42 = vector.broadcast %41 : vector<2x1xf32> to vector<2x256xf32>
    %43 = arith.mulf %40, %42 : vector<2x256xf32>
    %44 = arith.addf %34, %43 : vector<2x256xf32>
    %c0_27 = arith.constant 0 : index
    %c157 = arith.constant 157 : index
    %45 = vector.load %arg5[%c0_27, %c157] : memref<2x512xf32, #tpu.memory_space<vmem>>, vector<2x256xf32>
    %c0_28 = arith.constant 0 : index
    %c35 = arith.constant 35 : index
    %46 = vector.load %arg2[%c0_28, %c35] : memref<2x128xf32, #tpu.memory_space<vmem>>, vector<2x1xf32>
    %47 = vector.broadcast %46 : vector<2x1xf32> to vector<2x256xf32>
    %48 = arith.mulf %45, %47 : vector<2x256xf32>
    %49 = arith.addf %39, %48 : vector<2x256xf32>
    %c0_29 = arith.constant 0 : index
    %c173 = arith.constant 173 : index
    %50 = vector.load %arg5[%c0_29, %c173] : memref<2x512xf32, #tpu.memory_space<vmem>>, vector<2x256xf32>
    %c0_30 = arith.constant 0 : index
    %c42 = arith.constant 42 : index
    %51 = vector.load %arg2[%c0_30, %c42] : memref<2x128xf32, #tpu.memory_space<vmem>>, vector<2x1xf32>
    %52 = vector.broadcast %51 : vector<2x1xf32> to vector<2x256xf32>
    %53 = arith.mulf %50, %52 : vector<2x256xf32>
    %54 = arith.addf %44, %53 : vector<2x256xf32>
    %55 = arith.addf %54, %49 : vector<2x256xf32>
    %c0_31 = arith.constant 0 : index
    %c0_32 = arith.constant 0 : index
    %56 = vector.load %arg3[%c0_31, %c0_32] : memref<7x256xf32, #tpu.memory_space<vmem>>, vector<1x256xf32>
    %57 = vector.broadcast %56 : vector<1x256xf32> to vector<2x256xf32>
    %58 = arith.mulf %55, %57 : vector<2x256xf32>
    %59 = arith.addf %16, %58 : vector<2x256xf32>
    %cst_33 = arith.constant 0.000000e+00 : f32
    %60 = vector.broadcast %cst_33 : f32 to vector<2x256xf32>
    %cst_34 = arith.constant 0.000000e+00 : f32
    %61 = vector.broadcast %cst_34 : f32 to vector<2x256xf32>
    %c0_35 = arith.constant 0 : index
    %c78 = arith.constant 78 : index
    %62 = vector.load %arg5[%c0_35, %c78] : memref<2x512xf32, #tpu.memory_space<vmem>>, vector<2x256xf32>
    %c0_36 = arith.constant 0 : index
    %c1_37 = arith.constant 1 : index
    %63 = vector.load %arg2[%c0_36, %c1_37] : memref<2x128xf32, #tpu.memory_space<vmem>>, vector<2x1xf32>
    %64 = vector.broadcast %63 : vector<2x1xf32> to vector<2x256xf32>
    %65 = arith.mulf %62, %64 : vector<2x256xf32>
    %66 = arith.addf %60, %65 : vector<2x256xf32>
    %c0_38 = arith.constant 0 : index
    %c94 = arith.constant 94 : index
    %67 = vector.load %arg5[%c0_38, %c94] : memref<2x512xf32, #tpu.memory_space<vmem>>, vector<2x256xf32>
    %c0_39 = arith.constant 0 : index
    %c8 = arith.constant 8 : index
    %68 = vector.load %arg2[%c0_39, %c8] : memref<2x128xf32, #tpu.memory_space<vmem>>, vector<2x1xf32>
    %69 = vector.broadcast %68 : vector<2x1xf32> to vector<2x256xf32>
    %70 = arith.mulf %67, %69 : vector<2x256xf32>
    %71 = arith.addf %61, %70 : vector<2x256xf32>
    %c0_40 = arith.constant 0 : index
    %c110 = arith.constant 110 : index
    %72 = vector.load %arg5[%c0_40, %c110] : memref<2x512xf32, #tpu.memory_space<vmem>>, vector<2x256xf32>
    %c0_41 = arith.constant 0 : index
    %c15 = arith.constant 15 : index
    %73 = vector.load %arg2[%c0_41, %c15] : memref<2x128xf32, #tpu.memory_space<vmem>>, vector<2x1xf32>
    %74 = vector.broadcast %73 : vector<2x1xf32> to vector<2x256xf32>
    %75 = arith.mulf %72, %74 : vector<2x256xf32>
    %76 = arith.addf %66, %75 : vector<2x256xf32>
    %c0_42 = arith.constant 0 : index
    %c126 = arith.constant 126 : index
    %77 = vector.load %arg5[%c0_42, %c126] : memref<2x512xf32, #tpu.memory_space<vmem>>, vector<2x256xf32>
    %c0_43 = arith.constant 0 : index
    %c22 = arith.constant 22 : index
    %78 = vector.load %arg2[%c0_43, %c22] : memref<2x128xf32, #tpu.memory_space<vmem>>, vector<2x1xf32>
    %79 = vector.broadcast %78 : vector<2x1xf32> to vector<2x256xf32>
    %80 = arith.mulf %77, %79 : vector<2x256xf32>
    %81 = arith.addf %71, %80 : vector<2x256xf32>
    %c0_44 = arith.constant 0 : index
    %c142 = arith.constant 142 : index
    %82 = vector.load %arg5[%c0_44, %c142] : memref<2x512xf32, #tpu.memory_space<vmem>>, vector<2x256xf32>
    %c0_45 = arith.constant 0 : index
    %c29 = arith.constant 29 : index
    %83 = vector.load %arg2[%c0_45, %c29] : memref<2x128xf32, #tpu.memory_space<vmem>>, vector<2x1xf32>
    %84 = vector.broadcast %83 : vector<2x1xf32> to vector<2x256xf32>
    %85 = arith.mulf %82, %84 : vector<2x256xf32>
    %86 = arith.addf %76, %85 : vector<2x256xf32>
    %c0_46 = arith.constant 0 : index
    %c158 = arith.constant 158 : index
    %87 = vector.load %arg5[%c0_46, %c158] : memref<2x512xf32, #tpu.memory_space<vmem>>, vector<2x256xf32>
    %c0_47 = arith.constant 0 : index
    %c36 = arith.constant 36 : index
    %88 = vector.load %arg2[%c0_47, %c36] : memref<2x128xf32, #tpu.memory_space<vmem>>, vector<2x1xf32>
    %89 = vector.broadcast %88 : vector<2x1xf32> to vector<2x256xf32>
    %90 = arith.mulf %87, %89 : vector<2x256xf32>
    %91 = arith.addf %81, %90 : vector<2x256xf32>
    %c0_48 = arith.constant 0 : index
    %c174 = arith.constant 174 : index
    %92 = vector.load %arg5[%c0_48, %c174] : memref<2x512xf32, #tpu.memory_space<vmem>>, vector<2x256xf32>
    %c0_49 = arith.constant 0 : index
    %c43 = arith.constant 43 : index
    %93 = vector.load %arg2[%c0_49, %c43] : memref<2x128xf32, #tpu.memory_space<vmem>>, vector<2x1xf32>
    %94 = vector.broadcast %93 : vector<2x1xf32> to vector<2x256xf32>
    %95 = arith.mulf %92, %94 : vector<2x256xf32>
    %96 = arith.addf %86, %95 : vector<2x256xf32>
    %97 = arith.addf %96, %91 : vector<2x256xf32>
    %c1_50 = arith.constant 1 : index
    %c0_51 = arith.constant 0 : index
    %98 = vector.load %arg3[%c1_50, %c0_51] : memref<7x256xf32, #tpu.memory_space<vmem>>, vector<1x256xf32>
    %99 = vector.broadcast %98 : vector<1x256xf32> to vector<2x256xf32>
    %100 = arith.mulf %97, %99 : vector<2x256xf32>
    %101 = arith.addf %17, %100 : vector<2x256xf32>
    %cst_52 = arith.constant 0.000000e+00 : f32
    %102 = vector.broadcast %cst_52 : f32 to vector<2x256xf32>
    %cst_53 = arith.constant 0.000000e+00 : f32
    %103 = vector.broadcast %cst_53 : f32 to vector<2x256xf32>
    %c0_54 = arith.constant 0 : index
    %c79 = arith.constant 79 : index
    %104 = vector.load %arg5[%c0_54, %c79] : memref<2x512xf32, #tpu.memory_space<vmem>>, vector<2x256xf32>
    %c0_55 = arith.constant 0 : index
    %c2 = arith.constant 2 : index
    %105 = vector.load %arg2[%c0_55, %c2] : memref<2x128xf32, #tpu.memory_space<vmem>>, vector<2x1xf32>
    %106 = vector.broadcast %105 : vector<2x1xf32> to vector<2x256xf32>
    %107 = arith.mulf %104, %106 : vector<2x256xf32>
    %108 = arith.addf %102, %107 : vector<2x256xf32>
    %c0_56 = arith.constant 0 : index
    %c95 = arith.constant 95 : index
    %109 = vector.load %arg5[%c0_56, %c95] : memref<2x512xf32, #tpu.memory_space<vmem>>, vector<2x256xf32>
    %c0_57 = arith.constant 0 : index
    %c9 = arith.constant 9 : index
    %110 = vector.load %arg2[%c0_57, %c9] : memref<2x128xf32, #tpu.memory_space<vmem>>, vector<2x1xf32>
    %111 = vector.broadcast %110 : vector<2x1xf32> to vector<2x256xf32>
    %112 = arith.mulf %109, %111 : vector<2x256xf32>
    %113 = arith.addf %103, %112 : vector<2x256xf32>
    %c0_58 = arith.constant 0 : index
    %c111 = arith.constant 111 : index
    %114 = vector.load %arg5[%c0_58, %c111] : memref<2x512xf32, #tpu.memory_space<vmem>>, vector<2x256xf32>
    %c0_59 = arith.constant 0 : index
    %c16 = arith.constant 16 : index
    %115 = vector.load %arg2[%c0_59, %c16] : memref<2x128xf32, #tpu.memory_space<vmem>>, vector<2x1xf32>
    %116 = vector.broadcast %115 : vector<2x1xf32> to vector<2x256xf32>
    %117 = arith.mulf %114, %116 : vector<2x256xf32>
    %118 = arith.addf %108, %117 : vector<2x256xf32>
    %c0_60 = arith.constant 0 : index
    %c127 = arith.constant 127 : index
    %119 = vector.load %arg5[%c0_60, %c127] : memref<2x512xf32, #tpu.memory_space<vmem>>, vector<2x256xf32>
    %c0_61 = arith.constant 0 : index
    %c23 = arith.constant 23 : index
    %120 = vector.load %arg2[%c0_61, %c23] : memref<2x128xf32, #tpu.memory_space<vmem>>, vector<2x1xf32>
    %121 = vector.broadcast %120 : vector<2x1xf32> to vector<2x256xf32>
    %122 = arith.mulf %119, %121 : vector<2x256xf32>
    %123 = arith.addf %113, %122 : vector<2x256xf32>
    %c0_62 = arith.constant 0 : index
    %c143 = arith.constant 143 : index
    %124 = vector.load %arg5[%c0_62, %c143] : memref<2x512xf32, #tpu.memory_space<vmem>>, vector<2x256xf32>
    %c0_63 = arith.constant 0 : index
    %c30 = arith.constant 30 : index
    %125 = vector.load %arg2[%c0_63, %c30] : memref<2x128xf32, #tpu.memory_space<vmem>>, vector<2x1xf32>
    %126 = vector.broadcast %125 : vector<2x1xf32> to vector<2x256xf32>
    %127 = arith.mulf %124, %126 : vector<2x256xf32>
    %128 = arith.addf %118, %127 : vector<2x256xf32>
    %c0_64 = arith.constant 0 : index
    %c159 = arith.constant 159 : index
    %129 = vector.load %arg5[%c0_64, %c159] : memref<2x512xf32, #tpu.memory_space<vmem>>, vector<2x256xf32>
    %c0_65 = arith.constant 0 : index
    %c37 = arith.constant 37 : index
    %130 = vector.load %arg2[%c0_65, %c37] : memref<2x128xf32, #tpu.memory_space<vmem>>, vector<2x1xf32>
    %131 = vector.broadcast %130 : vector<2x1xf32> to vector<2x256xf32>
    %132 = arith.mulf %129, %131 : vector<2x256xf32>
    %133 = arith.addf %123, %132 : vector<2x256xf32>
    %c0_66 = arith.constant 0 : index
    %c175 = arith.constant 175 : index
    %134 = vector.load %arg5[%c0_66, %c175] : memref<2x512xf32, #tpu.memory_space<vmem>>, vector<2x256xf32>
    %c0_67 = arith.constant 0 : index
    %c44 = arith.constant 44 : index
    %135 = vector.load %arg2[%c0_67, %c44] : memref<2x128xf32, #tpu.memory_space<vmem>>, vector<2x1xf32>
    %136 = vector.broadcast %135 : vector<2x1xf32> to vector<2x256xf32>
    %137 = arith.mulf %134, %136 : vector<2x256xf32>
    %138 = arith.addf %128, %137 : vector<2x256xf32>
    %139 = arith.addf %138, %133 : vector<2x256xf32>
    %c2_68 = arith.constant 2 : index
    %c0_69 = arith.constant 0 : index
    %140 = vector.load %arg3[%c2_68, %c0_69] : memref<7x256xf32, #tpu.memory_space<vmem>>, vector<1x256xf32>
    %141 = vector.broadcast %140 : vector<1x256xf32> to vector<2x256xf32>
    %142 = arith.mulf %139, %141 : vector<2x256xf32>
    %143 = arith.addf %59, %142 : vector<2x256xf32>
    %cst_70 = arith.constant 0.000000e+00 : f32
    %144 = vector.broadcast %cst_70 : f32 to vector<2x256xf32>
    %cst_71 = arith.constant 0.000000e+00 : f32
    %145 = vector.broadcast %cst_71 : f32 to vector<2x256xf32>
    %c0_72 = arith.constant 0 : index
    %c80 = arith.constant 80 : index
    %146 = vector.load %arg5[%c0_72, %c80] : memref<2x512xf32, #tpu.memory_space<vmem>>, vector<2x256xf32>
    %c0_73 = arith.constant 0 : index
    %c3 = arith.constant 3 : index
    %147 = vector.load %arg2[%c0_73, %c3] : memref<2x128xf32, #tpu.memory_space<vmem>>, vector<2x1xf32>
    %148 = vector.broadcast %147 : vector<2x1xf32> to vector<2x256xf32>
    %149 = arith.mulf %146, %148 : vector<2x256xf32>
    %150 = arith.addf %144, %149 : vector<2x256xf32>
    %c0_74 = arith.constant 0 : index
    %c96 = arith.constant 96 : index
    %151 = vector.load %arg5[%c0_74, %c96] : memref<2x512xf32, #tpu.memory_space<vmem>>, vector<2x256xf32>
    %c0_75 = arith.constant 0 : index
    %c10 = arith.constant 10 : index
    %152 = vector.load %arg2[%c0_75, %c10] : memref<2x128xf32, #tpu.memory_space<vmem>>, vector<2x1xf32>
    %153 = vector.broadcast %152 : vector<2x1xf32> to vector<2x256xf32>
    %154 = arith.mulf %151, %153 : vector<2x256xf32>
    %155 = arith.addf %145, %154 : vector<2x256xf32>
    %c0_76 = arith.constant 0 : index
    %c112 = arith.constant 112 : index
    %156 = vector.load %arg5[%c0_76, %c112] : memref<2x512xf32, #tpu.memory_space<vmem>>, vector<2x256xf32>
    %c0_77 = arith.constant 0 : index
    %c17 = arith.constant 17 : index
    %157 = vector.load %arg2[%c0_77, %c17] : memref<2x128xf32, #tpu.memory_space<vmem>>, vector<2x1xf32>
    %158 = vector.broadcast %157 : vector<2x1xf32> to vector<2x256xf32>
    %159 = arith.mulf %156, %158 : vector<2x256xf32>
    %160 = arith.addf %150, %159 : vector<2x256xf32>
    %c0_78 = arith.constant 0 : index
    %c128_79 = arith.constant 128 : index
    %161 = vector.load %arg5[%c0_78, %c128_79] : memref<2x512xf32, #tpu.memory_space<vmem>>, vector<2x256xf32>
    %c0_80 = arith.constant 0 : index
    %c24 = arith.constant 24 : index
    %162 = vector.load %arg2[%c0_80, %c24] : memref<2x128xf32, #tpu.memory_space<vmem>>, vector<2x1xf32>
    %163 = vector.broadcast %162 : vector<2x1xf32> to vector<2x256xf32>
    %164 = arith.mulf %161, %163 : vector<2x256xf32>
    %165 = arith.addf %155, %164 : vector<2x256xf32>
    %c0_81 = arith.constant 0 : index
    %c144 = arith.constant 144 : index
    %166 = vector.load %arg5[%c0_81, %c144] : memref<2x512xf32, #tpu.memory_space<vmem>>, vector<2x256xf32>
    %c0_82 = arith.constant 0 : index
    %c31 = arith.constant 31 : index
    %167 = vector.load %arg2[%c0_82, %c31] : memref<2x128xf32, #tpu.memory_space<vmem>>, vector<2x1xf32>
    %168 = vector.broadcast %167 : vector<2x1xf32> to vector<2x256xf32>
    %169 = arith.mulf %166, %168 : vector<2x256xf32>
    %170 = arith.addf %160, %169 : vector<2x256xf32>
    %c0_83 = arith.constant 0 : index
    %c160 = arith.constant 160 : index
    %171 = vector.load %arg5[%c0_83, %c160] : memref<2x512xf32, #tpu.memory_space<vmem>>, vector<2x256xf32>
    %c0_84 = arith.constant 0 : index
    %c38 = arith.constant 38 : index
    %172 = vector.load %arg2[%c0_84, %c38] : memref<2x128xf32, #tpu.memory_space<vmem>>, vector<2x1xf32>
    %173 = vector.broadcast %172 : vector<2x1xf32> to vector<2x256xf32>
    %174 = arith.mulf %171, %173 : vector<2x256xf32>
    %175 = arith.addf %165, %174 : vector<2x256xf32>
    %c0_85 = arith.constant 0 : index
    %c176 = arith.constant 176 : index
    %176 = vector.load %arg5[%c0_85, %c176] : memref<2x512xf32, #tpu.memory_space<vmem>>, vector<2x256xf32>
    %c0_86 = arith.constant 0 : index
    %c45 = arith.constant 45 : index
    %177 = vector.load %arg2[%c0_86, %c45] : memref<2x128xf32, #tpu.memory_space<vmem>>, vector<2x1xf32>
    %178 = vector.broadcast %177 : vector<2x1xf32> to vector<2x256xf32>
    %179 = arith.mulf %176, %178 : vector<2x256xf32>
    %180 = arith.addf %170, %179 : vector<2x256xf32>
    %181 = arith.addf %180, %175 : vector<2x256xf32>
    %182 = arith.addf %101, %181 : vector<2x256xf32>
    %cst_87 = arith.constant 0.000000e+00 : f32
    %183 = vector.broadcast %cst_87 : f32 to vector<2x256xf32>
    %cst_88 = arith.constant 0.000000e+00 : f32
    %184 = vector.broadcast %cst_88 : f32 to vector<2x256xf32>
    %c0_89 = arith.constant 0 : index
    %c81 = arith.constant 81 : index
    %185 = vector.load %arg5[%c0_89, %c81] : memref<2x512xf32, #tpu.memory_space<vmem>>, vector<2x256xf32>
    %c0_90 = arith.constant 0 : index
    %c4 = arith.constant 4 : index
    %186 = vector.load %arg2[%c0_90, %c4] : memref<2x128xf32, #tpu.memory_space<vmem>>, vector<2x1xf32>
    %187 = vector.broadcast %186 : vector<2x1xf32> to vector<2x256xf32>
    %188 = arith.mulf %185, %187 : vector<2x256xf32>
    %189 = arith.addf %183, %188 : vector<2x256xf32>
    %c0_91 = arith.constant 0 : index
    %c97 = arith.constant 97 : index
    %190 = vector.load %arg5[%c0_91, %c97] : memref<2x512xf32, #tpu.memory_space<vmem>>, vector<2x256xf32>
    %c0_92 = arith.constant 0 : index
    %c11 = arith.constant 11 : index
    %191 = vector.load %arg2[%c0_92, %c11] : memref<2x128xf32, #tpu.memory_space<vmem>>, vector<2x1xf32>
    %192 = vector.broadcast %191 : vector<2x1xf32> to vector<2x256xf32>
    %193 = arith.mulf %190, %192 : vector<2x256xf32>
    %194 = arith.addf %184, %193 : vector<2x256xf32>
    %c0_93 = arith.constant 0 : index
    %c113 = arith.constant 113 : index
    %195 = vector.load %arg5[%c0_93, %c113] : memref<2x512xf32, #tpu.memory_space<vmem>>, vector<2x256xf32>
    %c0_94 = arith.constant 0 : index
    %c18 = arith.constant 18 : index
    %196 = vector.load %arg2[%c0_94, %c18] : memref<2x128xf32, #tpu.memory_space<vmem>>, vector<2x1xf32>
    %197 = vector.broadcast %196 : vector<2x1xf32> to vector<2x256xf32>
    %198 = arith.mulf %195, %197 : vector<2x256xf32>
    %199 = arith.addf %189, %198 : vector<2x256xf32>
    %c0_95 = arith.constant 0 : index
    %c129 = arith.constant 129 : index
    %200 = vector.load %arg5[%c0_95, %c129] : memref<2x512xf32, #tpu.memory_space<vmem>>, vector<2x256xf32>
    %c0_96 = arith.constant 0 : index
    %c25 = arith.constant 25 : index
    %201 = vector.load %arg2[%c0_96, %c25] : memref<2x128xf32, #tpu.memory_space<vmem>>, vector<2x1xf32>
    %202 = vector.broadcast %201 : vector<2x1xf32> to vector<2x256xf32>
    %203 = arith.mulf %200, %202 : vector<2x256xf32>
    %204 = arith.addf %194, %203 : vector<2x256xf32>
    %c0_97 = arith.constant 0 : index
    %c145 = arith.constant 145 : index
    %205 = vector.load %arg5[%c0_97, %c145] : memref<2x512xf32, #tpu.memory_space<vmem>>, vector<2x256xf32>
    %c0_98 = arith.constant 0 : index
    %c32 = arith.constant 32 : index
    %206 = vector.load %arg2[%c0_98, %c32] : memref<2x128xf32, #tpu.memory_space<vmem>>, vector<2x1xf32>
    %207 = vector.broadcast %206 : vector<2x1xf32> to vector<2x256xf32>
    %208 = arith.mulf %205, %207 : vector<2x256xf32>
    %209 = arith.addf %199, %208 : vector<2x256xf32>
    %c0_99 = arith.constant 0 : index
    %c161 = arith.constant 161 : index
    %210 = vector.load %arg5[%c0_99, %c161] : memref<2x512xf32, #tpu.memory_space<vmem>>, vector<2x256xf32>
    %c0_100 = arith.constant 0 : index
    %c39 = arith.constant 39 : index
    %211 = vector.load %arg2[%c0_100, %c39] : memref<2x128xf32, #tpu.memory_space<vmem>>, vector<2x1xf32>
    %212 = vector.broadcast %211 : vector<2x1xf32> to vector<2x256xf32>
    %213 = arith.mulf %210, %212 : vector<2x256xf32>
    %214 = arith.addf %204, %213 : vector<2x256xf32>
    %c0_101 = arith.constant 0 : index
    %c177 = arith.constant 177 : index
    %215 = vector.load %arg5[%c0_101, %c177] : memref<2x512xf32, #tpu.memory_space<vmem>>, vector<2x256xf32>
    %c0_102 = arith.constant 0 : index
    %c46 = arith.constant 46 : index
    %216 = vector.load %arg2[%c0_102, %c46] : memref<2x128xf32, #tpu.memory_space<vmem>>, vector<2x1xf32>
    %217 = vector.broadcast %216 : vector<2x1xf32> to vector<2x256xf32>
    %218 = arith.mulf %215, %217 : vector<2x256xf32>
    %219 = arith.addf %209, %218 : vector<2x256xf32>
    %220 = arith.addf %219, %214 : vector<2x256xf32>
    %c4_103 = arith.constant 4 : index
    %c0_104 = arith.constant 0 : index
    %221 = vector.load %arg3[%c4_103, %c0_104] : memref<7x256xf32, #tpu.memory_space<vmem>>, vector<1x256xf32>
    %222 = vector.broadcast %221 : vector<1x256xf32> to vector<2x256xf32>
    %223 = arith.mulf %220, %222 : vector<2x256xf32>
    %224 = arith.addf %143, %223 : vector<2x256xf32>
    %cst_105 = arith.constant 0.000000e+00 : f32
    %225 = vector.broadcast %cst_105 : f32 to vector<2x256xf32>
    %cst_106 = arith.constant 0.000000e+00 : f32
    %226 = vector.broadcast %cst_106 : f32 to vector<2x256xf32>
    %c0_107 = arith.constant 0 : index
    %c82 = arith.constant 82 : index
    %227 = vector.load %arg5[%c0_107, %c82] : memref<2x512xf32, #tpu.memory_space<vmem>>, vector<2x256xf32>
    %c0_108 = arith.constant 0 : index
    %c5 = arith.constant 5 : index
    %228 = vector.load %arg2[%c0_108, %c5] : memref<2x128xf32, #tpu.memory_space<vmem>>, vector<2x1xf32>
    %229 = vector.broadcast %228 : vector<2x1xf32> to vector<2x256xf32>
    %230 = arith.mulf %227, %229 : vector<2x256xf32>
    %231 = arith.addf %225, %230 : vector<2x256xf32>
    %c0_109 = arith.constant 0 : index
    %c98 = arith.constant 98 : index
    %232 = vector.load %arg5[%c0_109, %c98] : memref<2x512xf32, #tpu.memory_space<vmem>>, vector<2x256xf32>
    %c0_110 = arith.constant 0 : index
    %c12 = arith.constant 12 : index
    %233 = vector.load %arg2[%c0_110, %c12] : memref<2x128xf32, #tpu.memory_space<vmem>>, vector<2x1xf32>
    %234 = vector.broadcast %233 : vector<2x1xf32> to vector<2x256xf32>
    %235 = arith.mulf %232, %234 : vector<2x256xf32>
    %236 = arith.addf %226, %235 : vector<2x256xf32>
    %c0_111 = arith.constant 0 : index
    %c114 = arith.constant 114 : index
    %237 = vector.load %arg5[%c0_111, %c114] : memref<2x512xf32, #tpu.memory_space<vmem>>, vector<2x256xf32>
    %c0_112 = arith.constant 0 : index
    %c19 = arith.constant 19 : index
    %238 = vector.load %arg2[%c0_112, %c19] : memref<2x128xf32, #tpu.memory_space<vmem>>, vector<2x1xf32>
    %239 = vector.broadcast %238 : vector<2x1xf32> to vector<2x256xf32>
    %240 = arith.mulf %237, %239 : vector<2x256xf32>
    %241 = arith.addf %231, %240 : vector<2x256xf32>
    %c0_113 = arith.constant 0 : index
    %c130 = arith.constant 130 : index
    %242 = vector.load %arg5[%c0_113, %c130] : memref<2x512xf32, #tpu.memory_space<vmem>>, vector<2x256xf32>
    %c0_114 = arith.constant 0 : index
    %c26 = arith.constant 26 : index
    %243 = vector.load %arg2[%c0_114, %c26] : memref<2x128xf32, #tpu.memory_space<vmem>>, vector<2x1xf32>
    %244 = vector.broadcast %243 : vector<2x1xf32> to vector<2x256xf32>
    %245 = arith.mulf %242, %244 : vector<2x256xf32>
    %246 = arith.addf %236, %245 : vector<2x256xf32>
    %c0_115 = arith.constant 0 : index
    %c146 = arith.constant 146 : index
    %247 = vector.load %arg5[%c0_115, %c146] : memref<2x512xf32, #tpu.memory_space<vmem>>, vector<2x256xf32>
    %c0_116 = arith.constant 0 : index
    %c33 = arith.constant 33 : index
    %248 = vector.load %arg2[%c0_116, %c33] : memref<2x128xf32, #tpu.memory_space<vmem>>, vector<2x1xf32>
    %249 = vector.broadcast %248 : vector<2x1xf32> to vector<2x256xf32>
    %250 = arith.mulf %247, %249 : vector<2x256xf32>
    %251 = arith.addf %241, %250 : vector<2x256xf32>
    %c0_117 = arith.constant 0 : index
    %c162 = arith.constant 162 : index
    %252 = vector.load %arg5[%c0_117, %c162] : memref<2x512xf32, #tpu.memory_space<vmem>>, vector<2x256xf32>
    %c0_118 = arith.constant 0 : index
    %c40 = arith.constant 40 : index
    %253 = vector.load %arg2[%c0_118, %c40] : memref<2x128xf32, #tpu.memory_space<vmem>>, vector<2x1xf32>
    %254 = vector.broadcast %253 : vector<2x1xf32> to vector<2x256xf32>
    %255 = arith.mulf %252, %254 : vector<2x256xf32>
    %256 = arith.addf %246, %255 : vector<2x256xf32>
    %c0_119 = arith.constant 0 : index
    %c178 = arith.constant 178 : index
    %257 = vector.load %arg5[%c0_119, %c178] : memref<2x512xf32, #tpu.memory_space<vmem>>, vector<2x256xf32>
    %c0_120 = arith.constant 0 : index
    %c47 = arith.constant 47 : index
    %258 = vector.load %arg2[%c0_120, %c47] : memref<2x128xf32, #tpu.memory_space<vmem>>, vector<2x1xf32>
    %259 = vector.broadcast %258 : vector<2x1xf32> to vector<2x256xf32>
    %260 = arith.mulf %257, %259 : vector<2x256xf32>
    %261 = arith.addf %251, %260 : vector<2x256xf32>
    %262 = arith.addf %261, %256 : vector<2x256xf32>
    %c5_121 = arith.constant 5 : index
    %c0_122 = arith.constant 0 : index
    %263 = vector.load %arg3[%c5_121, %c0_122] : memref<7x256xf32, #tpu.memory_space<vmem>>, vector<1x256xf32>
    %264 = vector.broadcast %263 : vector<1x256xf32> to vector<2x256xf32>
    %265 = arith.mulf %262, %264 : vector<2x256xf32>
    %266 = arith.addf %182, %265 : vector<2x256xf32>
    %cst_123 = arith.constant 0.000000e+00 : f32
    %267 = vector.broadcast %cst_123 : f32 to vector<2x256xf32>
    %cst_124 = arith.constant 0.000000e+00 : f32
    %268 = vector.broadcast %cst_124 : f32 to vector<2x256xf32>
    %c0_125 = arith.constant 0 : index
    %c83 = arith.constant 83 : index
    %269 = vector.load %arg5[%c0_125, %c83] : memref<2x512xf32, #tpu.memory_space<vmem>>, vector<2x256xf32>
    %c0_126 = arith.constant 0 : index
    %c6 = arith.constant 6 : index
    %270 = vector.load %arg2[%c0_126, %c6] : memref<2x128xf32, #tpu.memory_space<vmem>>, vector<2x1xf32>
    %271 = vector.broadcast %270 : vector<2x1xf32> to vector<2x256xf32>
    %272 = arith.mulf %269, %271 : vector<2x256xf32>
    %273 = arith.addf %267, %272 : vector<2x256xf32>
    %c0_127 = arith.constant 0 : index
    %c99 = arith.constant 99 : index
    %274 = vector.load %arg5[%c0_127, %c99] : memref<2x512xf32, #tpu.memory_space<vmem>>, vector<2x256xf32>
    %c0_128 = arith.constant 0 : index
    %c13 = arith.constant 13 : index
    %275 = vector.load %arg2[%c0_128, %c13] : memref<2x128xf32, #tpu.memory_space<vmem>>, vector<2x1xf32>
    %276 = vector.broadcast %275 : vector<2x1xf32> to vector<2x256xf32>
    %277 = arith.mulf %274, %276 : vector<2x256xf32>
    %278 = arith.addf %268, %277 : vector<2x256xf32>
    %c0_129 = arith.constant 0 : index
    %c115 = arith.constant 115 : index
    %279 = vector.load %arg5[%c0_129, %c115] : memref<2x512xf32, #tpu.memory_space<vmem>>, vector<2x256xf32>
    %c0_130 = arith.constant 0 : index
    %c20 = arith.constant 20 : index
    %280 = vector.load %arg2[%c0_130, %c20] : memref<2x128xf32, #tpu.memory_space<vmem>>, vector<2x1xf32>
    %281 = vector.broadcast %280 : vector<2x1xf32> to vector<2x256xf32>
    %282 = arith.mulf %279, %281 : vector<2x256xf32>
    %283 = arith.addf %273, %282 : vector<2x256xf32>
    %c0_131 = arith.constant 0 : index
    %c131 = arith.constant 131 : index
    %284 = vector.load %arg5[%c0_131, %c131] : memref<2x512xf32, #tpu.memory_space<vmem>>, vector<2x256xf32>
    %c0_132 = arith.constant 0 : index
    %c27 = arith.constant 27 : index
    %285 = vector.load %arg2[%c0_132, %c27] : memref<2x128xf32, #tpu.memory_space<vmem>>, vector<2x1xf32>
    %286 = vector.broadcast %285 : vector<2x1xf32> to vector<2x256xf32>
    %287 = arith.mulf %284, %286 : vector<2x256xf32>
    %288 = arith.addf %278, %287 : vector<2x256xf32>
    %c0_133 = arith.constant 0 : index
    %c147 = arith.constant 147 : index
    %289 = vector.load %arg5[%c0_133, %c147] : memref<2x512xf32, #tpu.memory_space<vmem>>, vector<2x256xf32>
    %c0_134 = arith.constant 0 : index
    %c34 = arith.constant 34 : index
    %290 = vector.load %arg2[%c0_134, %c34] : memref<2x128xf32, #tpu.memory_space<vmem>>, vector<2x1xf32>
    %291 = vector.broadcast %290 : vector<2x1xf32> to vector<2x256xf32>
    %292 = arith.mulf %289, %291 : vector<2x256xf32>
    %293 = arith.addf %283, %292 : vector<2x256xf32>
    %c0_135 = arith.constant 0 : index
    %c163 = arith.constant 163 : index
    %294 = vector.load %arg5[%c0_135, %c163] : memref<2x512xf32, #tpu.memory_space<vmem>>, vector<2x256xf32>
    %c0_136 = arith.constant 0 : index
    %c41 = arith.constant 41 : index
    %295 = vector.load %arg2[%c0_136, %c41] : memref<2x128xf32, #tpu.memory_space<vmem>>, vector<2x1xf32>
    %296 = vector.broadcast %295 : vector<2x1xf32> to vector<2x256xf32>
    %297 = arith.mulf %294, %296 : vector<2x256xf32>
    %298 = arith.addf %288, %297 : vector<2x256xf32>
    %c0_137 = arith.constant 0 : index
    %c179 = arith.constant 179 : index
    %299 = vector.load %arg5[%c0_137, %c179] : memref<2x512xf32, #tpu.memory_space<vmem>>, vector<2x256xf32>
    %c0_138 = arith.constant 0 : index
    %c48 = arith.constant 48 : index
    %300 = vector.load %arg2[%c0_138, %c48] : memref<2x128xf32, #tpu.memory_space<vmem>>, vector<2x1xf32>
    %301 = vector.broadcast %300 : vector<2x1xf32> to vector<2x256xf32>
    %302 = arith.mulf %299, %301 : vector<2x256xf32>
    %303 = arith.addf %293, %302 : vector<2x256xf32>
    %304 = arith.addf %303, %298 : vector<2x256xf32>
    %c6_139 = arith.constant 6 : index
    %c0_140 = arith.constant 0 : index
    %305 = vector.load %arg3[%c6_139, %c0_140] : memref<7x256xf32, #tpu.memory_space<vmem>>, vector<1x256xf32>
    %306 = vector.broadcast %305 : vector<1x256xf32> to vector<2x256xf32>
    %307 = arith.mulf %304, %306 : vector<2x256xf32>
    %308 = arith.addf %224, %307 : vector<2x256xf32>
    %309 = arith.addf %308, %266 : vector<2x256xf32>
    %cst_141 = arith.constant dense<0.000000e+00> : vector<256xf32>
    %310 = vector.multi_reduction <add>, %309, %cst_141 [0] : vector<2x256xf32> to vector<256xf32>
    %311 = vector.shape_cast %310 : vector<256xf32> to vector<1x256xf32>
    %312 = arith.negf %311 : vector<1x256xf32>
    %313 = math.exp %312 : vector<1x256xf32>
    %cst_142 = arith.constant 1.000000e+00 : f32
    %314 = vector.broadcast %cst_142 : f32 to vector<1x256xf32>
    %315 = arith.addf %314, %313 : vector<1x256xf32>
    %316 = arith.divf %314, %315 : vector<1x256xf32>
    %c0_143 = arith.constant 0 : index
    %c0_144 = arith.constant 0 : index
    %c0_145 = arith.constant 0 : index
    %317 = vector.load %arg1[%c0_143, %c0_144, %c0_145] : memref<1x4x256xf32, #tpu.memory_space<vmem>>, vector<1x4x256xf32>
    %318 = vector.shape_cast %317 : vector<1x4x256xf32> to vector<4x256xf32>
    %319 = vector.broadcast %316 : vector<1x256xf32> to vector<4x256xf32>
    %320 = arith.mulf %318, %319 : vector<4x256xf32>
    %c0_146 = arith.constant 0 : index
    %c0_147 = arith.constant 0 : index
    %c0_148 = arith.constant 0 : index
    %321 = vector.load %arg4[%c0_146, %c0_147, %c0_148] : memref<1x4x256xf32, #tpu.memory_space<vmem>>, vector<1x4x256xf32>
    %322 = vector.shape_cast %321 : vector<1x4x256xf32> to vector<4x256xf32>
    %323 = vector.shape_cast %320 : vector<4x256xf32> to vector<1x4x256xf32>
    tpu.vector_store %arg4[%c0_146, %c0_147, %c0_148], %323 {strides = array<i32>} : memref<1x4x256xf32, #tpu.memory_space<vmem>>, vector<1x4x256xf32>,
    return
  }
  func.func @transform_0(%arg0: i32) -> (i32, i32, i32) {
    %c0_i32 = arith.constant 0 : i32
    %c0_i32_0 = arith.constant 0 : i32
    %c0_i32_1 = arith.constant 0 : i32
    return %arg0, %c0_i32, %c0_i32_0 : i32, i32, i32
  }
  func.func @transform_1(%arg0: i32) -> (i32, i32) {
    %c0_i32 = arith.constant 0 : i32
    %c0_i32_0 = arith.constant 0 : i32
    %c0_i32_1 = arith.constant 0 : i32
    return %c0_i32, %c0_i32_0 : i32, i32
  }
  func.func @transform_2(%arg0: i32) -> (i32, i32) {
    %c0_i32 = arith.constant 0 : i32
    %c0_i32_0 = arith.constant 0 : i32
    %c0_i32_1 = arith.constant 0 : i32
    return %c0_i32, %c0_i32_0 : i32, i32
  }
  func.func @transform_3(%arg0: i32) -> (i32, i32, i32) {
    %c0_i32 = arith.constant 0 : i32
    %c0_i32_0 = arith.constant 0 : i32
    %c0_i32_1 = arith.constant 0 : i32
    return %arg0, %c0_i32, %c0_i32_0 : i32, i32, i32
  }
}

</mosaic_0001>

<bundles_post_ra>
// kernel: tpu_custom_call.1
= control target key start
LH: loop header
LB: loop body
LE: loop exit
PB: predicated region body
PF: predicated region fallthrough
CT: control target
= control target key end

     0   :  { %8 = vsyncpa [#allocation4], 0  ;;  %s2338_s0 = inlined_call_operand.hbm [shape: f32[2,4,256], index: 0, kind: input, shape index: {}]   ;;  %s2339_s1 = inlined_call_operand.hbm [shape: f32[2,128], index: 1, kind: input, shape index: {}]   ;;  %s2340_s2 = inlined_call_operand.hbm [shape: f32[7,256], index: 2, kind: input, shape index: {}]   ;;  %s2341_s3 = inlined_call_operand.hbm [shape: f32[2,4,256], index: 3, kind: output, shape index: {}]  }
   0x1   :  { %10 = vsyncpa [#allocation4 + $0x1], 0 }
   0x2   :  { %11 = vsyncpa [#allocation7], 0 }
   0x3   :  { %12 = vsyncpa [#allocation5], 0 }
   0x4   :  { %14 = vsyncpa [#allocation5 + $0x1], 0  ;;  %s1852_s12 = smov 0   ;;  %s1854_s13 = smov 0  }
   0x5   :  { %s1856_s14 = smov 0   ;;  %s1858_s15 = smov 0  }
   0x6 LB: > { %s1873_s16 = sadd.s32 4294967295, %s1762_s15   ;;  %s1384_s17 = sadd.s32 4294967294, %s1762_s15   ;;  %s1762_s15 = sphi %s1858_s15, %s2353_s15   ;;  %s1758_s14 = sphi %s1856_s14, %s2352_s14   ;;  %s1754_s13 = sphi %s1854_s13, %s2351_s13   ;;  %s1750_s12 = sphi %s1852_s12, %s2350_s12  }
   0x7   : > { %p40_p0 = scmp.ne.s32.totalorder %s1754_s13, %s1750_s12  ;;  %p41_p1 = scmp.eq.s32.totalorder %s1873_s16, 0 }
   0x8   : > { %p106_p2 = scmp.eq.s32.totalorder %s1873_s16, 1  ;;  %p112_p3 = scmp.eq.s32.totalorder %s1384_s17, 1 }
   0x9   : > { %p1882_p4 = por %p41_p1, %p40_p0  ;;  %p1385_p5 = scmp.ge.s32.totalorder %s1762_s15, 1 }
   0xa   : > { %p1887_p6 = por %p112_p3, %p40_p0  ;;  %p119_p7 = scmp.lt.s32.totalorder %s1762_s15, 3 }
   0xb   : > { %s131_s22 = sshll.u32 %s2339_s1, 4  ;;  %s1764_s24 = smov [#allocation6]   ;;  %s132_s22 = int_to_ptr.hbm [resolvable:$true] %s131_s22 }
   0xc   : > { %p1895_p8 = pnand %p1385_p5, %p119_p7  ;;  %s133_s25 = sshll.u32 %s1764_s24, 4  ;;  %s134_s25 = int_to_ptr.vmem [resolvable:$true] %s133_s25 }
   0xd   : > { %s143_s28 = sshll.u32 %s2340_s2, 4  ;;  %s1765_s29 = smov [#allocation8]   ;;  %s144_s28 = int_to_ptr.hbm [resolvable:$true] %s143_s28 }
   0xe   : > { %p1419_p10 = pneg %p1895_p8  ;;  %s145_s30 = sshll.u32 %s1765_s29, 4  ;;  %s146_s30 = int_to_ptr.vmem [resolvable:$true] %s145_s30 }
   0xf   : > { %s1908_s4 = sadd.s32 1, %s1762_s15   ;;  %s27_s5 = sadd.s32 1, %s1758_s14 }
  0x10   : > { %p1420_p11 = pnand %p1419_p10, %p41_p1  ;;  %s24_s6 = ssub.s32 %s1762_s15, %s1908_s4 }
  0x11   : > { %p34_p12 = scmp.ne.s32.totalorder %s1758_s14, %s1754_s13  ;;  %p25_p13 = scmp.eq.s32.totalorder %s24_s6, 0 }
  0x12   : > { %1422 = dma.hbm_to_vmem [thread:$0]  (!%p1420_p11), %s132_s22, 32, %s134_s25, [#allocation7]  }
  0x13   : > { %1425 = dma.hbm_to_vmem [thread:$0]  (!%p1420_p11), %s144_s28, 256, %s146_s30, [#allocation7]  }
  0x14   : > { %p35_p0 = scmp.eq.s32.totalorder %s1762_s15, 0  ;;  %p1918_p3 = por %p106_p2, %p34_p12 }
  0x15   : > { %p1436_p5 = scmp.lt.s32.totalorder %s1762_s15, 2  ;;  %s156_s9 = sand.u32 1, %s1758_s14  }
  0x16   : > { %s1924_s8 = scalar_select %p25_p13, %s1758_s14, %s27_s5  }
  0x17   : > { %p36_p7 = por %p35_p0, %p34_p12  ;;  %s1389_s10 = sshll.u32 %s156_s9, 3 }
  0x18   : > { %s1405_s11 = sshll.u32 %s1762_s15, 3  ;;  %s160_s22 = scalar_lea.vmem [#allocation3], %s1389_s10 }
  0x19   : > { %s165_s21 = scalar_lea.hbm %s2338_s0, %s1405_s11  ;;  %s169_s24 = sshll.u32 %s160_s22, 4  ;;  %s170_s24 = int_to_ptr.vmem [resolvable:$true] %s169_s24 }
  0x1a   : > { %s167_s25 = sshll.u32 %s165_s21, 4  ;;  %p1931_p2 = pnand %p1436_p5, %p36_p7  ;;  %s168_s25 = int_to_ptr.hbm [resolvable:$true] %s167_s25 }
  0x1b   : > { %s157_s27 = scalar_lea.sflag [#allocation4], %s156_s9  ;;  %s1662_s28 = sshra.s32 %s168_s25, 4  ;;  %s1663_s28 = int_to_ptr.hbm [resolvable:$true] %s1662_s28 }
  0x1c   : > { %s1664_s29 = scalar_lea.hbm %s1663_s28, 8  ;;  %p1666_p11 = pneg %p1931_p2 }
  0x1d   : > { %p1665_p10 = scmp.ne.s32.totalorder %s1663_s28, %s1664_s29  ;;  %s1669_s6 = scalar_lea.hbm %s2338_s0, 16 }
  0x1e   : > { %p1670_p0 = scmp.lt.s32.totalorder %s1663_s28, %s2338_s0  ;;  %p1671_p5 = scmp.lt.s32.totalorder %s1669_s6, %s1664_s29 }
  0x1f   : > { %p1667_p12 = pnand %p1666_p11, %p1665_p10 }
  0x20   : > { %p1672_p7 = por %p1671_p5, %p1670_p0 }
  0x21   : > { %p1668_p13 = pneg %p1667_p12 }
  0x23   : > { %p1673_p9 = pnand %p1672_p7, %p1668_p13 }
  0x25   : > { %1676 = shalt.err (!%p1673_p9)
}
  0x26   : > { %1429 = dma.hbm_to_vmem [thread:$0]  (!%p1931_p2), %s168_s25, 128, %s170_s24, %s157_s27  }
  0x27   : > { %178 = sbr.rel (%p1895_p8) target bundleno = 948 (0x3b4), region = 32  ;;  %s1948_s9 = sand.u32 (!%p1895_p8), 1, %s1754_s13  }
  0x28   : > { %s1393_s17 = sshll.u32 (!%p1895_p8), %s1948_s9, 3  ;;  %s181_s20 = scalar_lea.sflag (!%p1895_p8), [#allocation4], %s1948_s9 }
  0x29   : > { %s1954_s21 = scalar_lea.vmem (!%p1895_p8), [#allocation3], %s1393_s17 }
  0x2c   : > { %1737 = dma.done.wait (%p1882_p4), %s181_s20, 128  }
  0x2d   : > { %1739 = vsyncadd (%p1882_p4), %s181_s20, 4294967168 }
  0x2e   : > { %1741 = dma.done.wait (%p41_p1), [#allocation7], 288  }
  0x2f   : > { %1743 = vsyncadd (%p41_p1), [#allocation7], 4294967008  ;;  %v1766_v0 = vmov 21   ;;  %v1767_v1 = vmov 14   ;;  %v1768_v2 = vmov 0   ;;  %v220_v3 = vld [vmem:[%s1954_s21] sm:$0xff]  ;;  %v269_v58 = vlaneseq }
  0x30   : > { %1543 = vset.pattern.permute.xlu2 %v1766_v0  ;;  %1542 = vset.pattern.permute.xlu1 %v1767_v1  ;;  %v1965_v4 = vld [vmem:[#allocation6] sm:$0x3]  ;;  %222 = vst [vmem:[#allocation1] ss:$2 sm:$0xff] %v220_v3  ;;  %v1769_v5 = vmov 28   ;;  %v1770_v6 = vmov 42  }
  0x31   : > { %1540 = vset.pattern.permute.xlu0 %v1768_v2  ;;  %323 = vperm.xlu2 %1543, %v1965_v4   ;;  %v1771_v7 = vmov 7   ;;  %v397_v8 = vld [vmem:[#allocation8] ss:$8 sm:$0x3]  ;;  %v1772_v10 = vmov 1   ;;  %v1773_v11 = vmov 35  }
  0x32   : > { %306 = vperm.xlu1 %1542, %v1965_v4   ;;  %286 = vperm.xlu0 %1540, %v1965_v4   ;;  %v400_v9 = vperm.slane %v397_v8, 1  ;;  %v1774_v12 = vmov 8   ;;  %v399_v13 = vperm.slane %v397_v8, 0  ;;  %vm402_vm0 = vcmask 1041408   ;;  %s1776_s18 = smov 77   ;;  %s1779_s23 = smov 78  }
  0x33   : > { %v520_v15 = vld [vmem:[#allocation8 + $0x1] ss:$8 sm:$0x3]  ;;  %v1775_v18 = vmov 36   ;;  %v1777_v19 = vmov 22   ;;  %v1778_v20 = vmov 15  }
  0x34   : > { %v401_v14 = vrot.slane %v400_v9, 6  ;;  %v523_v17 = vperm.slane %v520_v15, 1  ;;  %v522_v21 = vperm.slane %v520_v15, 0  ;;  %v1780_v26 = vmov 16   ;;  %s1793_s22 = smov 96   ;;  %s1796_s24 = smov 64  }
  0x35   : > { %v1781_v27 = vmov 29   ;;  %vm227_vm1 = vcmask 1043456   ;;  %v1782_v40 = vmov 43   ;;  %v1783_v49 = vmov 2   ;;  %s1799_s25 = smov 32   ;;  %s1821_s26 = smov 112  }
  0x36   : > { %v403_v16 = vsel %vm402_vm0, %v399_v13, %v401_v14  ;;  %v524_v22 = vrot.slane %v523_v17, 6  ;;  %vm266_vm2 = vcmask 1040384   ;;  %v1784_v59 = vmov 0.0   ;;  %s1822_s27 = smov 82   ;;  %s1824_s28 = smov 79  }
  0x37   : > { %v223_v23 = vld.sshfl [vmem:[#allocation1] sm:$0xff pattern:$0x75316420]  ;;  %v224_v24 = vld.sshfl [vmem:[#allocation1 + $0x8] sm:$0xff pattern:$0x75316420] }
  0x38   : > { %244 = vst [vmem:[#allocation1] ss:$2 sm:$0xff] %v220_v3  ;;  %v525_v25 = vsel %vm402_vm0, %v522_v21, %v524_v22  ;;  %v235_v29 = vsel %vm227_vm1, %v224_v24, 0.0  ;;  %v228_v34 = vsel %vm227_vm1, %v223_v23, 0.0  ;;  %vm271_vm3 = vcmp.lt.s32.totalorder %v269_v58, 256  ;;  %s1825_s29 = smov 81  }
  0x39   : > { %1546 = vset.pattern.permute.xlu2 %v1770_v6  ;;  %v236_v31 = vrot.slane %v235_v29, 4  ;;  %v229_v36 = vrot.slane %v228_v34, 4  ;;  %218 = vst [vmem:[#allocation2] sm:$0x3] %v1784_v59  ;;  %v1785_v1 = vmov 24   ;;  %v1786_v3 = vmov 38  }
  0x3a   : > { %1544 = vset.pattern.permute.xlu1 %v1769_v5  ;;  %1541 = vset.pattern.permute.xlu0 %v1771_v7  ;;  %219 = vst [vmem:[#allocation2 + $0x6] sm:$0x3] %v1784_v59  ;;  %v1787_v5 = vmov 26   ;;  %v1788_v6 = vmov 23   ;;  %v1789_v7 = vmov 30   ;;  %v1792_v15 = vmov 40  }
  0x3b   : > { %340 = vperm.xlu1 %1544, %v1965_v4   ;;  %296 = vperm.xlu0 %1541, %v1965_v4   ;;  %v237_v37 = vadd.f32 %v236_v31, %v235_v29  ;;  %v230_v41 = vadd.f32 %v229_v36, %v228_v34  ;;  %v1790_v8 = vmov 269488144   ;;  %v1801_v58 = vmov 12   ;;  %s1826_s30 = smov 83   ;;  %s1827_s5 = smov 126  }
  0x3c   : > { %373 = vperm.xlu2 %1546, %v1965_v4   ;;  %v289_v9 = vunpack.c.l.s4 %v1790_v8  ;;  %vm318_vm4 = vcmask 785408   ;;  %vm352_vm5 = vcmask 523264   ;;  %vm385_vm6 = vcmask 261120   ;;  %s1828_s6 = smov 124   ;;  %s1829_s10 = smov 122  }
  0x3d   : > { %v238_v42 = vrot.slane %v237_v37, 2  ;;  %v231_v45 = vrot.slane %v230_v41, 2  ;;  %vm393_vm7 = vcmask 916480   ;;  %vm407_vm8 = vcmask 629760   ;;  %s1830_s11 = smov 127   ;;  %s1831_s20 = smov 51  }
  0x3e   : > { %vm529_vm9 = vcmask 637952   ;;  %vm1024_vm10 = vcmask 670720   ;;  %vm651_vm11 = vcmask 646144   ;;  %vm895_vm12 = vcmask 662528  }
  0x3f   : > { %v246_v28 = vld.sshfl [vmem:[#allocation1 + $0x8] sm:$0xff pattern:$0x75316420]  ;;  %v245_v32 = vld.sshfl [vmem:[#allocation1] sm:$0xff pattern:$0x75316420]  ;;  %v239_v46 = vadd.f32 %v238_v42, %v237_v37  ;;  %v232_v50 = vadd.f32 %v231_v45, %v230_v41 }
  0x40   : > { %v256_v30 = vsel %vm227_vm1, %v246_v28, -inf  ;;  %v249_v35 = vsel %vm227_vm1, %v245_v32, -inf  ;;  %vm1152_vm13 = vcmask 678912   ;;  %vm659_vm14 = vcmask 1031168  }
  0x41   : > { %v257_v33 = vrot.slane %v256_v30, 4  ;;  %v250_v38 = vrot.slane %v249_v35, 4  ;;  %v240_v51 = vrot.slane %v239_v46, 1  ;;  %v233_v54 = vrot.slane %v232_v50, 1 }
  0x42   : > { %vm903_vm15 = vcmask 1014784  }
  0x43   : > { %1547 = vset.pattern.permute.xlu1 %v1772_v10  ;;  %1545 = vset.pattern.permute.xlu0 %v1773_v11  ;;  %v258_v39 = vmax.f32 %v256_v30, %v257_v33  ;;  %v251_v43 = vmax.f32 %v249_v35, %v250_v38  ;;  %v241_v55 = vadd.f32 %v240_v51, %v239_v46  ;;  %v1791_v10 = vmov 9  }
  0x44   : > { %413 = vperm.xlu1 %1547, %v1965_v4   ;;  %357 = vperm.xlu0 %1545, %v1965_v4   ;;  %v234_v60 = vadd.f32 %v233_v54, %v232_v50  ;;  %v1995_v11 = vunpack.c.0.s8 %v289_v9  ;;  %v1797_v35 = vmov 17   ;;  %v1798_v46 = vmov 10  }
  0x45   : > { %1548 = vset.pattern.permute.xlu2 %v1774_v12  ;;  %v259_v44 = vrot.slane %v258_v39, 2  ;;  %v252_v47 = vrot.slane %v251_v43, 2  ;;  %v265_v62 = vrot.slane %v241_v55, 7 }
  0x46   : > { %423 = vperm.xlu2 %1548, %v1965_v4  }
  0x47   : > { %v260_v48 = vmax.f32 %v258_v39, %v259_v44  ;;  %v253_v52 = vmax.f32 %v251_v43, %v252_v47  ;;  %v267_v0 = vsel %vm266_vm2, %v234_v60, %v265_v62 }
  0x48   : > { %274 = vst.msk [vmem:[#allocation2 + $0x2] ss:$2 sm:$0x3] %vm271_vm3, %v267_v0 }
  0x49   : > { %v261_v53 = vrot.slane %v260_v48, 1  ;;  %v254_v56 = vrot.slane %v253_v52, 1 }
  0x4b   : > { %v262_v57 = vmax.f32 %v260_v48, %v261_v53  ;;  %v255_v61 = vmax.f32 %v253_v52, %v254_v56 }
  0x4c   : > { %1552 = vset.pattern.permute.xlu1 %v1775_v18  ;;  %404 = vrot.lane.b32.xlu0 %v403_v16, %s1776_s18  ;;  %v1794_v18 = vmov 25   ;;  %s1406_s18 = sshll.u32 %s1873_s16, 3  ;;  %s1279_s16 = scalar_lea.sflag [#allocation5], %s1948_s9 }
  0x4d   : > { %481 = vperm.xlu1 %1552, %v1965_v4   ;;  %1549 = vset.pattern.permute.xlu0 %v1778_v20  ;;  %v277_v63 = vrot.slane %v262_v57, 7  ;;  %v1795_v20 = vmov 37  }
  0x4e   : > { %1550 = vset.pattern.permute.xlu2 %v1777_v19 }
  0x4f   : > { %449 = vperm.xlu2 %1550, %v1965_v4   ;;  %v278_v2 = vsel %vm266_vm2, %v255_v61, %v277_v63  ;;  %v1802_v63 = vmov 27   ;;  %vm1160_vm2 = vcmask 998400  }
  0x50   : > { %281 = vst.msk [vmem:[#allocation2 + $0x3] ss:$2 sm:$0x3] %vm271_vm3, %v278_v2  ;;  %vm1168_vm3 = vcmask 1039360  }
  0x54   : > { %433 = vperm.xlu0 %1549, %v1965_v4  }
  0x55   : > { %526 = vrot.lane.b32.xlu1 %v525_v25, %s1779_s23 }
  0x56   : > { %1556 = vset.pattern.permute.xlu1 %v1780_v26 }
  0x57   : > { %1551 = vset.pattern.permute.xlu2 %v1781_v27  ;;  %v1997_v13 = vld [vmem:[#allocation2] sm:$0x3f] }
  0x58   : > { %465 = vperm.xlu2 %1551, %v1965_v4   ;;  %v2010_v26 = vld [vmem:[#allocation2 + $0x2] sm:$0x3f] }
  0x59   : > { %v699_v52 = vld [vmem:[#allocation2 + $0x2] sm:$0xf] }
  0x5c   : > { %1553 = vset.pattern.permute.xlu0 %v1782_v40 }
  0x5d   : > { %555 = vperm.xlu1 %1556, %v1965_v4   ;;  %497 = vperm.xlu0 %1553, %v1965_v4  }
  0x60   : > { %1554 = vset.pattern.permute.xlu2 %v1783_v49  ;;  %v1800_v49 = vmov 31  }
  0x61   : > { %535 = vperm.xlu2 %1554, %v1965_v4  }
  0x65   : > { %1558 = vset.pattern.permute.xlu1 %v1787_v5  ;;  %1555 = vset.pattern.permute.xlu0 %v1791_v10  ;;  %v1803_v5 = vmov 19  }
  0x66   : > { %944 = vperm.xlu1 %1558, %v1965_v4   ;;  %545 = vperm.xlu0 %1555, %v1965_v4  }
  0x69   : > { %1557 = vset.pattern.permute.xlu2 %v1785_v1 }
  0x6a   : > { %701 = vperm.xlu2 %1557, %v1965_v4  }
  0x6e   : > { %1560 = vset.pattern.permute.xlu0 %v1792_v15  ;;  %1564 = vset.pattern.permute.xlu1 %v1797_v35 }
  0x6f   : > { %976 = vperm.xlu0 %1560, %v1965_v4  }
  0x72   : > { %1559 = vset.pattern.permute.xlu2 %v1786_v3 }
  0x73   : > { %733 = vperm.xlu2 %1559, %v1965_v4  }
  0x77   : > { %1563 = vset.pattern.permute.xlu0 %v1795_v20  ;;  %v1805_v20 = vmov 47  }
  0x7b   : > { %1561 = vset.pattern.permute.xlu2 %v1788_v6  ;;  %v1804_v6 = vmov 45  }
  0x7c   : > { %571 = vperm.xlu2 %1561, %v1965_v4  }
  0x84   : > { %1562 = vset.pattern.permute.xlu2 %v1789_v7 }
  0x85   : > { %587 = vperm.xlu2 %1562, %v1965_v4  }
  0x8b   : > { %v324_v12 = vpop.permute.xlu2 %323 }
  0x8c   : > { %v328_v14 = vperm.slane %v324_v12, %v1995_v11 }
  0x8d   : > { %1565 = vset.pattern.permute.xlu2 %v1794_v18 }
  0x8e   : > { %v330_v16 = vmul.f32 %v328_v14, %v1997_v13 }
  0x90   : > { %332 = vrot.lane.b32.xlu2 %v330_v16, %s1793_s22 }
  0x96   : > { %v374_v17 = vpop.permute.xlu2 %373 }
  0x97   : > { %v378_v40 = vperm.slane %v374_v17, %v1995_v11 }
  0x99   : > { %v380_v44 = vmul.f32 %v378_v40, %v2010_v26 }
  0xa0   : > { %v2003_v19 = vpop.permute.xlu2 %423 }
  0xa4   : > { %v307_v21 = vpop.permute.xlu1 %306  ;;  %v2006_v23 = vpop.permute.xlu0 %286 }
  0xa5   : > { %v311_v22 = vperm.slane %v307_v21, %v1995_v11  ;;  %v291_v35 = vperm.slane %v2006_v23, %v1995_v11  ;;  %v1812_v23 = vmov 46  }
  0xa7   : > { %v313_v24 = vmul.f32 %v311_v22, %v1997_v13  ;;  %v1806_v22 = vmov 39  }
  0xa9   : > { %315 = vrot.lane.b32.xlu1 %v313_v24, %s1793_s22  ;;  %v450_v25 = vpop.permute.xlu2 %449  ;;  %v1807_v24 = vmov 44  }
  0xaa   : > { %v454_v56 = vperm.slane %v450_v25, %v1995_v11 }
  0xac   : > { %v456_v57 = vmul.f32 %v454_v56, %v1997_v13 }
  0xad   : > { %v341_v27 = vpop.permute.xlu1 %340  ;;  %v2012_v28 = vpop.permute.xlu0 %296 }
  0xae   : > { %v345_v29 = vperm.slane %v341_v27, %v1995_v11  ;;  %v301_v8 = vperm.slane %v2012_v28, %v1995_v11  ;;  %v1808_v27 = vmov 33  }
  0xb0   : > { %v347_v30 = vmul.f32 %v345_v29, %v2010_v26  ;;  %v303_v15 = vmul.f32 %v301_v8, %v1997_v13 }
  0xb2   : > { %349 = vrot.lane.b32.xlu2 %v347_v30, %s1796_s24  ;;  %v466_v31 = vpop.permute.xlu2 %465 }
  0xb3   : > { %v470_v32 = vperm.slane %v466_v31, %v1995_v11  ;;  %v1809_v31 = vmov 20  }
  0xb5   : > { %v472_v33 = vmul.f32 %v470_v32, %v2010_v26  ;;  %v1810_v32 = vmov 41  }
  0xb6   : > { %v2019_v34 = vpop.permute.xlu1 %413  ;;  %v358_v36 = vpop.permute.xlu0 %357 }
  0xb7   : > { %474 = vrot.lane.b32.xlu0 %v472_v33, %s1796_s24  ;;  %v362_v37 = vperm.slane %v358_v36, %v1995_v11  ;;  %v1811_v33 = vmov 18  }
  0xb9   : > { %v364_v38 = vmul.f32 %v362_v37, %v2010_v26 }
  0xba   : > { %815 = vperm.xlu2 %1565, %v1965_v4  }
  0xbb   : > { %v2025_v39 = vpop.permute.xlu2 %535  ;;  %366 = vrot.lane.b32.xlu1 %v364_v38, %s1796_s24 }
  0xbe   : > { %v2029_v41 = vpop.permute.xlu0 %404 }
  0xbf   : > { %v482_v42 = vpop.permute.xlu1 %481  ;;  %603 = vperm.xlu0 %1563, %v1965_v4  }
  0xc0   : > { %v486_v43 = vperm.slane %v482_v42, %v1995_v11 }
  0xc2   : > { %v488_v45 = vmul.f32 %v486_v43, %v2010_v26  ;;  %1567 = vset.pattern.permute.xlu2 %v1798_v46  ;;  %v293_v43 = vmul.f32 %v291_v35, %v1997_v13 }
  0xc3   : > { %382 = vrot.lane.b32.xlu1 %v380_v44, %s1799_s25 }
  0xc4   : > { %490 = vrot.lane.b32.xlu2 %v488_v45, %s1796_s24  ;;  %v702_v47 = vpop.permute.xlu2 %701 }
  0xc5   : > { %v706_v51 = vperm.slane %v702_v47, %v1995_v11 }
  0xc6   : > { %v434_v48 = vpop.permute.xlu0 %433 }
  0xc7   : > { %1568 = vset.pattern.permute.xlu0 %v1800_v49  ;;  %v438_v50 = vperm.slane %v434_v48, %v1995_v11  ;;  %v708_v54 = vmul.f32 %v706_v51, %v699_v52  ;;  %v2048_v60 = vpop.permute.xlu1 %526  ;;  %v1813_v49 = vmov 11   ;;  %v1814_v51 = vmov 3  }
  0xc8   : > { %717 = vperm.xlu0 %1568, %v1965_v4   ;;  %v1815_v52 = vmov 5  }
  0xc9   : > { %v440_v53 = vmul.f32 %v438_v50, %v1997_v13 }
  0xcb   : > { %442 = vrot.lane.b32.xlu1 %v440_v53, %s1793_s22 }
  0xcc   : > { %674 = vperm.xlu2 %1567, %v1965_v4  }
  0xcd   : > { %v734_v55 = vpop.permute.xlu2 %733 }
  0xce   : > { %v738_v9 = vperm.slane %v734_v55, %v1995_v11 }
  0xcf   : > { %v498_v61 = vpop.permute.xlu0 %497  ;;  %v556_v2 = vpop.permute.xlu1 %555 }
  0xd0   : > { %710 = vrot.lane.b32.xlu0 %v708_v54, %s1793_s22  ;;  %v502_v62 = vperm.slane %v498_v61, %v1995_v11  ;;  %v560_v3 = vperm.slane %v556_v2, %v1995_v11  ;;  %v740_v16 = vmul.f32 %v738_v9, %v2010_v26 }
  0xd1   : > { %1574 = vset.pattern.permute.xlu0 %v1805_v20 }
  0xd2   : > { %v504_v0 = vmul.f32 %v502_v62, %v2010_v26  ;;  %v562_v7 = vmul.f32 %v560_v3, %v1997_v13 }
  0xd3   : > { %458 = vrot.lane.b32.xlu1 %v456_v57, %s1793_s22 }
  0xd4   : > { %1570 = vset.pattern.permute.xlu2 %v1801_v58 }
  0xd5   : > { %918 = vperm.xlu2 %1570, %v1965_v4  }
  0xd6   : > { %v572_v59 = vpop.permute.xlu2 %571 }
  0xd7   : > { %v576_v12 = vperm.slane %v572_v59, %v1995_v11  ;;  %v1816_v59 = vmov 32  }
  0xd8   : > { %992 = vperm.xlu0 %1574, %v1965_v4   ;;  %v945_v25 = vpop.permute.xlu1 %944  ;;  %v2079_v29 = vpop.permute.xlu0 %545 }
  0xd9   : > { %v578_v21 = vmul.f32 %v576_v12, %v1997_v13  ;;  %v949_v28 = vperm.slane %v945_v25, %v1995_v11 }
  0xdb   : > { %684 = vperm.xlu1 %1564, %v1965_v4   ;;  %v951_v30 = vmul.f32 %v949_v28, %v2010_v26 }
  0xdd   : > { %1572 = vset.pattern.permute.xlu2 %v1802_v63 }
  0xde   : > { %1072 = vperm.xlu2 %1572, %v1965_v4  }
  0xdf   : > { %v2054_v1 = vpop.permute.xlu2 %587 }
  0xe0   : > { %1577 = vset.pattern.permute.xlu0 %v1807_v24 }
  0xe1   : > { %619 = vperm.xlu0 %1577, %v1965_v4   ;;  %v977_v40 = vpop.permute.xlu0 %976 }
  0xe2   : > { %v981_v46 = vperm.slane %v977_v40, %v1995_v11 }
  0xe3   : > { %506 = vrot.lane.b32.xlu1 %v504_v0, %s1799_s25 }
  0xe4   : > { %1566 = vset.pattern.permute.xlu1 %v1803_v5  ;;  %v983_v50 = vmul.f32 %v981_v46, %v2010_v26 }
  0xe6   : > { %1573 = vset.pattern.permute.xlu2 %v1804_v6 }
  0xe7   : > { %749 = vperm.xlu2 %1573, %v1965_v4  }
  0xe9   : > { %1582 = vset.pattern.permute.xlu0 %v1809_v31 }
  0xea   : > { %v333_v10 = vpop.permute.xlu2 %332  ;;  %1056 = vperm.xlu0 %1582, %v1965_v4  }
  0xeb   : > { %v334_v14 = vrot.slane %v333_v10, 2  ;;  %564 = vrot.lane.b32.xlu1 %v562_v7, %s1793_s22  ;;  %v418_v7 = vperm.slane %v2019_v34, %v1995_v11 }
  0xed   : > { %v335_v17 = vsel %vm318_vm4, %v333_v10, %v334_v14  ;;  %v420_v14 = vmul.f32 %v418_v7, %v1997_v13 }
  0xee   : > { %v2068_v18 = vadd.f32 %v335_v17, %v303_v15  ;;  %v1817_v15 = vmov 13  }
  0xef   : > { %742 = vrot.lane.b32.xlu2 %v740_v16, %s1796_s24 }
  0xf0   : > { %1576 = vset.pattern.permute.xlu2 %v1811_v33 }
  0xf2   : > { %1583 = vset.pattern.permute.xlu0 %v1812_v23 }
  0xf3   : > { %580 = vrot.lane.b32.xlu1 %v578_v21, %s1793_s22  ;;  %863 = vperm.xlu0 %1583, %v1965_v4   ;;  %v428_v21 = vperm.slane %v2003_v19, %v1995_v11 }
  0xf5   : > { %v430_v28 = vmul.f32 %v428_v21, %v1997_v13 }
  0xf7   : > { %799 = vperm.xlu2 %1576, %v1965_v4  }
  0xfb   : > { %928 = vperm.xlu1 %1566, %v1965_v4  }
  0xff   : > { %1579 = vset.pattern.permute.xlu2 %v1813_v49  ;;  %v1818_v49 = vmov 34  }
 0x100   : > { %789 = vperm.xlu2 %1579, %v1965_v4  }
 0x103   : > { %1569 = vset.pattern.permute.xlu1 %v1806_v22 }
 0x104   : > { %847 = vperm.xlu1 %1569, %v1965_v4  }
 0x108   : > { %1581 = vset.pattern.permute.xlu2 %v1815_v52 }
 0x109   : > { %908 = vperm.xlu2 %1581, %v1965_v4  }
 0x10c   : > { %1571 = vset.pattern.permute.xlu1 %v1808_v27  ;;  %v350_v36 = vpop.permute.xlu2 %349 }
 0x10d   : > { %960 = vperm.xlu1 %1571, %v1965_v4   ;;  %v351_v37 = vrot.slane %v350_v36, 6 }
 0x10f   : > { %v353_v44 = vsel %vm352_vm5, %v351_v37, %v350_v36 }
 0x111   : > { %1585 = vset.pattern.permute.xlu2 %v1818_v49 }
 0x114   : > { %v816_v54 = vpop.permute.xlu2 %815 }
 0x115   : > { %953 = vrot.lane.b32.xlu1 %v951_v30, %s1793_s22  ;;  %v820_v10 = vperm.slane %v816_v54, %v1995_v11 }
 0x116   : > { %1575 = vset.pattern.permute.xlu1 %v1810_v32 }
 0x117   : > { %v822_v34 = vmul.f32 %v820_v10, %v2010_v26 }
 0x11b   : > { %v316_v38 = vpop.permute.xlu1 %315 }
 0x11c   : > { %v317_v42 = vrot.slane %v316_v38, 2 }
 0x11d   : > { %1104 = vperm.xlu1 %1575, %v1965_v4  }
 0x11e   : > { %v319_v45 = vsel %vm318_vm4, %v316_v38, %v317_v42  ;;  %v491_v2 = vpop.permute.xlu2 %490 }
 0x11f   : > { %v321_v47 = vadd.f32 %v319_v45, %v293_v43  ;;  %v492_v25 = vrot.slane %v491_v2, 6 }
 0x121   : > { %v355_v48 = vadd.f32 %v353_v44, %v321_v47  ;;  %v493_v32 = vsel %vm352_vm5, %v492_v25, %v491_v2 }
 0x125   : > { %985 = vrot.lane.b32.xlu1 %v983_v50, %s1796_s24 }
 0x126   : > { %1578 = vset.pattern.permute.xlu1 %v1814_v51  ;;  %v540_v51 = vperm.slane %v2025_v39, %v1995_v11 }
 0x128   : > { %v542_v54 = vmul.f32 %v540_v51, %v1997_v13 }
 0x129   : > { %v475_v53 = vpop.permute.xlu0 %474 }
 0x12a   : > { %v476_v8 = vrot.slane %v475_v53, 6 }
 0x12c   : > { %v477_v16 = vsel %vm352_vm5, %v476_v8, %v475_v53 }
 0x12d   : > { %664 = vperm.xlu1 %1578, %v1965_v4   ;;  %v367_v55 = vpop.permute.xlu1 %366 }
 0x12e   : > { %v368_v56 = vrot.slane %v367_v55, 6 }
 0x130   : > { %v369_v57 = vsel %vm352_vm5, %v368_v56, %v367_v55 }
 0x131   : > { %v2100_v58 = vadd.f32 %v369_v57, %v2068_v18  ;;  %v604_v62 = vpop.permute.xlu0 %603  ;;  %v2115_v18 = vpop.permute.xlu2 %674 }
 0x132   : > { %v608_v0 = vperm.slane %v604_v62, %v1995_v11  ;;  %v679_v21 = vperm.slane %v2115_v18, %v1995_v11 }
 0x134   : > { %v610_v6 = vmul.f32 %v608_v0, %v2010_v26 }
 0x135   : > { %1580 = vset.pattern.permute.xlu1 %v1816_v59  ;;  %v383_v61 = vpop.permute.xlu1 %382 }
 0x136   : > { %v384_v63 = vrot.slane %v383_v61, 6  ;;  %831 = vperm.xlu1 %1580, %v1965_v4  }
 0x138   : > { %v386_v3 = vsel %vm385_vm6, %v384_v63, %v383_v61  ;;  %v550_v61 = vperm.slane %v2079_v29, %v1995_v11 }
 0x139   : > { %v2105_v5 = vadd.f32 %v386_v3, %v355_v48  ;;  %v2124_v33 = vpop.permute.xlu2 %918 }
 0x13a   : > { %v718_v36 = vpop.permute.xlu0 %717  ;;  %v552_v0 = vmul.f32 %v550_v61, %v1997_v13 }
 0x13b   : > { %v722_v19 = vperm.slane %v718_v36, %v1995_v11  ;;  %v1015_v36 = vld [vmem:[#allocation8 + $0x5] ss:$8 sm:$0x3] }
 0x13d   : > { %v443_v9 = vpop.permute.xlu1 %442  ;;  %v724_v42 = vmul.f32 %v722_v19, %v2010_v26 }
 0x13e   : > { %v444_v12 = vrot.slane %v443_v9, 2  ;;  %612 = vrot.lane.b32.xlu1 %v610_v6, %s1796_s24 }
 0x13f   : > { %1584 = vset.pattern.permute.xlu1 %v1817_v15 }
 0x140   : > { %v445_v17 = vsel %vm318_vm4, %v443_v9, %v444_v12 }
 0x141   : > { %v447_v20 = vadd.f32 %v445_v17, %v420_v14  ;;  %v1073_v43 = vpop.permute.xlu2 %1072  ;;  %v1819_v17 = vmov 48  }
 0x142   : > { %v1077_v45 = vperm.slane %v1073_v43, %v1995_v11  ;;  %v711_v23 = vpop.permute.xlu0 %710 }
 0x143   : > { %v479_v22 = vadd.f32 %v477_v16, %v447_v20 }
 0x144   : > { %v1079_v50 = vmul.f32 %v1077_v45, %v2010_v26  ;;  %v1017_v45 = vperm.slane %v1015_v36, 0 }
 0x145   : > { %v459_v24 = vpop.permute.xlu1 %458 }
 0x146   : > { %v460_v27 = vrot.slane %v459_v24, 2  ;;  %824 = vrot.lane.b32.xlu1 %v822_v34, %s1793_s22  ;;  %v1820_v34 = vmov 4  }
 0x147   : > { %1587 = vset.pattern.permute.xlu0 %v1820_v34 }
 0x148   : > { %v461_v30 = vsel %vm318_vm4, %v459_v24, %v460_v27 }
 0x149   : > { %v463_v31 = vadd.f32 %v461_v30, %v430_v28  ;;  %v750_v10 = vpop.permute.xlu2 %749  ;;  %v681_v28 = vmul.f32 %v679_v21, %v1997_v13 }
 0x14a   : > { %v993_v57 = vpop.permute.xlu0 %992  ;;  %v754_v20 = vperm.slane %v750_v10, %v1995_v11 }
 0x14b   : > { %v2126_v35 = vadd.f32 %v493_v32, %v463_v31  ;;  %v997_v59 = vperm.slane %v993_v57, %v1995_v11 }
 0x14c   : > { %v756_v25 = vmul.f32 %v754_v20, %v2010_v26 }
 0x14d   : > { %v685_v37 = vpop.permute.xlu1 %684  ;;  %v999_v62 = vmul.f32 %v997_v59, %v2010_v26 }
 0x14e   : > { %v689_v38 = vperm.slane %v685_v37, %v1995_v11  ;;  %1046 = vperm.xlu1 %1584, %v1965_v4  }
 0x150   : > { %v691_v40 = vmul.f32 %v689_v38, %v1997_v13  ;;  %v1018_v38 = vperm.slane %v1015_v36, 1 }
 0x151   : > { %v743_v27 = vpop.permute.xlu2 %742 }
 0x152   : > { %693 = vrot.lane.b32.xlu2 %v691_v40, %s1793_s22  ;;  %v744_v31 = vrot.slane %v743_v27, 6 }
 0x154   : > { %v745_v37 = vsel %vm352_vm5, %v744_v31, %v743_v27 }
 0x155   : > { %v507_v44 = vpop.permute.xlu1 %506 }
 0x156   : > { %v508_v46 = vrot.slane %v507_v44, 6  ;;  %726 = vrot.lane.b32.xlu1 %v724_v42, %s1796_s24 }
 0x158   : > { %v509_v47 = vsel %vm385_vm6, %v508_v46, %v507_v44  ;;  %v923_v44 = vperm.slane %v2124_v33, %v1995_v11  ;;  %v1019_v46 = vrot.slane %v1018_v38, 6 }
 0x159   : > { %v2137_v48 = vadd.f32 %v509_v47, %v479_v22  ;;  %v712_v22 = vrot.slane %v711_v23, 6 }
 0x15a   : > { %v925_v49 = vmul.f32 %v923_v44, %v1997_v13 }
 0x15b   : > { %v713_v30 = vsel %vm318_vm4, %v712_v22, %v711_v23  ;;  %v620_v23 = vpop.permute.xlu0 %619 }
 0x15c   : > { %v715_v32 = vadd.f32 %v713_v30, %v681_v28 }
 0x15d   : > { %v565_v52 = vpop.permute.xlu1 %564 }
 0x15e   : > { %v566_v53 = vrot.slane %v565_v52, 2  ;;  %1081 = vrot.lane.b32.xlu1 %v1079_v50, %s1793_s22  ;;  %v747_v40 = vadd.f32 %v745_v37, %v715_v32 }
 0x160   : > { %v567_v55 = vsel %vm318_vm4, %v565_v52, %v566_v53  ;;  %v1020_v53 = vsel %vm402_vm0, %v1017_v45, %v1019_v46 }
 0x161   : > { %v2145_v56 = vadd.f32 %v567_v55, %v542_v54  ;;  %v592_v55 = vperm.slane %v2054_v1, %v1995_v11 }
 0x163   : > { %v1057_v59 = vpop.permute.xlu0 %1056  ;;  %v594_v61 = vmul.f32 %v592_v55, %v2010_v26 }
 0x165   : > { %v581_v63 = vpop.permute.xlu1 %580 }
 0x166   : > { %v582_v39 = vrot.slane %v581_v63, 2  ;;  %1001 = vrot.lane.b32.xlu1 %v999_v62, %s1799_s25  ;;  %v800_v62 = vpop.permute.xlu2 %799 }
 0x167   : > { %v804_v1 = vperm.slane %v800_v62, %v1995_v11 }
 0x168   : > { %v583_v2 = vsel %vm318_vm4, %v581_v63, %v582_v39 }
 0x169   : > { %v2154_v3 = vadd.f32 %v583_v2, %v552_v0 }
 0x16b   : > { %v864_v0 = vpop.permute.xlu0 %863 }
 0x16d   : > { %v929_v6 = vpop.permute.xlu1 %928 }
 0x16e   : > { %v933_v7 = vperm.slane %v929_v6, %v1995_v11  ;;  %v868_v6 = vperm.slane %v864_v0, %v1995_v11 }
 0x170   : > { %v935_v8 = vmul.f32 %v933_v7, %v1997_v13  ;;  %v790_v7 = vpop.permute.xlu2 %789 }
 0x171   : > { %v794_v36 = vperm.slane %v790_v7, %v1995_v11 }
 0x172   : > { %937 = vrot.lane.b32.xlu2 %v935_v8, %s1793_s22  ;;  %v870_v8 = vmul.f32 %v868_v6, %v2010_v26 }
 0x176   : > { %v848_v29 = vpop.permute.xlu1 %847 }
 0x177   : > { %v852_v9 = vperm.slane %v848_v29, %v1995_v11  ;;  %v624_v29 = vperm.slane %v620_v23, %v1995_v11 }
 0x179   : > { %v854_v14 = vmul.f32 %v852_v9, %v2010_v26  ;;  %v626_v9 = vmul.f32 %v624_v29, %v2010_v26 }
 0x17a   : > { %1088 = vperm.xlu2 %1585, %v1965_v4  }
 0x17f   : > { %v961_v12 = vpop.permute.xlu1 %960 }
 0x180   : > { %v965_v15 = vperm.slane %v961_v12, %v1995_v11  ;;  %v1823_v12 = vmov 6  }
 0x181   : > { %1588 = vset.pattern.permute.xlu1 %v1823_v12 }
 0x182   : > { %v967_v16 = vmul.f32 %v965_v15, %v2010_v26  ;;  %856 = vrot.lane.b32.xlu2 %v854_v14, %s1796_s24  ;;  %v2210_v14 = vpop.permute.xlu2 %908 }
 0x183   : > { %1586 = vset.pattern.permute.xlu2 %v1819_v17 }
 0x184   : > { %969 = vrot.lane.b32.xlu0 %v967_v16, %s1796_s24 }
 0x187   : > { %v954_v24 = vpop.permute.xlu1 %953 }
 0x188   : > { %v955_v42 = vrot.slane %v954_v24, 6 }
 0x18a   : > { %1120 = vperm.xlu2 %1586, %v1965_v4   ;;  %v956_v47 = vsel %vm318_vm4, %v955_v42, %v954_v24  ;;  %v796_v42 = vmul.f32 %v794_v36, %v1997_v13 }
 0x18b   : > { %v958_v52 = vadd.f32 %v956_v47, %v925_v49 }
 0x18c   : > { %758 = vrot.lane.b32.xlu0 %v756_v25, %s1799_s25 }
 0x18f   : > { %v1105_v19 = vpop.permute.xlu1 %1104 }
 0x190   : > { %v1109_v18 = vperm.slane %v1105_v19, %v1995_v11 }
 0x192   : > { %v1111_v43 = vmul.f32 %v1109_v18, %v2010_v26 }
 0x194   : > { %765 = vrot.lane.b32.xlu0 %v747_v40, %s1821_s26  ;;  %1113 = vrot.lane.b32.xlu2 %v1111_v43, %s1796_s24 }
 0x197   : > { %v986_v50 = vpop.permute.xlu1 %985 }
 0x198   : > { %v987_v51 = vrot.slane %v986_v50, 6 }
 0x19a   : > { %v988_v54 = vsel %vm352_vm5, %v987_v51, %v986_v50 }
 0x19b   : > { %v990_v33 = vadd.f32 %v988_v54, %v958_v52 }
 0x19c   : > { %1021 = vrot.lane.b32.xlu2 %v1020_v53, %s1822_s27  ;;  %779 = vperm.xlu0 %1587, %v1965_v4  }
 0x19d   : > { %1008 = vrot.lane.b32.xlu1 %v990_v33, %s1821_s26 }
 0x19f   : > { %v2189_v57 = vpop.permute.xlu1 %664 }
 0x1a4   : > { %390 = vrot.lane.b32.xlu2 %v2100_v58, %s1821_s26  ;;  %1589 = vset.pattern.permute.xlu0 %v1819_v17  ;;  %v806_v58 = vmul.f32 %v804_v1, %v1997_v13  ;;  %v642_v17 = vld [vmem:[#allocation8 + $0x2] ss:$8 sm:$0x3] }
 0x1a5   : > { %596 = vrot.lane.b32.xlu1 %v594_v61, %s1796_s24  ;;  %v645_v34 = vperm.slane %v642_v17, 1 }
 0x1a7   : > { %v646_v24 = vrot.slane %v645_v34, 6 }
 0x1a8   : > { %v832_v63 = vpop.permute.xlu1 %831 }
 0x1a9   : > { %v836_v39 = vperm.slane %v832_v63, %v1995_v11 }
 0x1ab   : > { %v838_v2 = vmul.f32 %v836_v39, %v2010_v26 }
 0x1ac   : > { %513 = vrot.lane.b32.xlu2 %v2126_v35, %s1821_s26  ;;  %v1061_v35 = vperm.slane %v1057_v59, %v1995_v11  ;;  %v2217_v22 = vpop.permute.xlu2 %693  ;;  %v1143_v59 = vld [vmem:[#allocation8 + $0x6] ss:$8 sm:$0x3] }
 0x1ad   : > { %840 = vrot.lane.b32.xlu0 %v838_v2, %s1796_s24  ;;  %1036 = vperm.xlu1 %1588, %v1965_v4   ;;  %v644_v4 = vperm.slane %v642_v17, 0  ;;  %v1146_v61 = vperm.slane %v1143_v59, 1  ;;  %v1145_v39 = vperm.slane %v1143_v59, 0 }
 0x1ae   : > { %v1063_v16 = vmul.f32 %v1061_v35, %v1997_v13 }
 0x1af   : > { %v647_v27 = vsel %vm402_vm0, %v644_v4, %v646_v24  ;;  %v1147_v0 = vrot.slane %v1146_v61, 6 }
 0x1b0   : > { %v613_v10 = vpop.permute.xlu1 %612 }
 0x1b1   : > { %v614_v15 = vrot.slane %v613_v10, 6  ;;  %v1148_v2 = vsel %vm402_vm0, %v1145_v39, %v1147_v0 }
 0x1b3   : > { %v615_v20 = vsel %vm352_vm5, %v614_v15, %v613_v10  ;;  %v695_v10 = vrot.slane %v2217_v22, 2  ;;  %v406_v15 = vrot.slane %v2029_v41, 6 }
 0x1b4   : > { %808 = vrot.lane.b32.xlu2 %v806_v58, %s1793_s22  ;;  %v617_v21 = vadd.f32 %v615_v20, %v2154_v3  ;;  %v886_v3 = vld [vmem:[#allocation8 + $0x4] ss:$8 sm:$0x3] }
 0x1b5   : > { %872 = vrot.lane.b32.xlu0 %v870_v8, %s1799_s25  ;;  %1065 = vrot.lane.b32.xlu1 %v1063_v16, %s1793_s22  ;;  %v889_v18 = vperm.slane %v886_v3, 1  ;;  %v888_v38 = vperm.slane %v886_v3, 0  ;;  %v696_v34 = vsel %vm318_vm4, %v2217_v22, %v695_v10  ;;  %v408_v24 = vsel %vm407_vm8, %v406_v15, %v2029_v41 }
 0x1b7   : > { %v890_v40 = vrot.slane %v889_v18, 6 }
 0x1b8   : > { %v825_v25 = vpop.permute.xlu1 %824 }
 0x1b9   : > { %v826_v37 = vrot.slane %v825_v25, 6  ;;  %v891_v44 = vsel %vm402_vm0, %v888_v38, %v890_v40 }
 0x1bb   : > { %v827_v43 = vsel %vm318_vm4, %v826_v37, %v825_v25  ;;  %v913_v25 = vperm.slane %v2210_v14, %v1995_v11 }
 0x1bc   : > { %628 = vrot.lane.b32.xlu2 %v626_v9, %s1799_s25  ;;  %v829_v23 = vadd.f32 %v827_v43, %v796_v42  ;;  %v669_v9 = vperm.slane %v2189_v57, %v1995_v11 }
 0x1bd   : > { %v915_v41 = vmul.f32 %v913_v25, %v1997_v13 }
 0x1be   : > { %v671_v20 = vmul.f32 %v669_v9, %v1997_v13 }
 0x1c0   : > { %v1047_v30 = vpop.permute.xlu1 %1046 }
 0x1c1   : > { %v1051_v54 = vperm.slane %v1047_v30, %v1995_v11  ;;  %v698_v30 = vadd.f32 %v696_v34, %v671_v20 }
 0x1c3   : > { %v1053_v62 = vmul.f32 %v1051_v54, %v1997_v13 }
 0x1c4   : > { %635 = vrot.lane.b32.xlu2 %v617_v21, %s1821_s26 }
 0x1c8   : > { %v727_v45 = vpop.permute.xlu1 %726 }
 0x1c9   : > { %v728_v16 = vrot.slane %v727_v45, 6 }
 0x1cc   : > { %v2221_v28 = vpop.permute.xlu2 %937  ;;  %648 = vrot.lane.b32.xlu2 %v647_v27, %s1824_s28  ;;  %v729_v27 = vsel %vm352_vm5, %v728_v16, %v727_v45 }
 0x1cd   : > { %v731_v22 = vadd.f32 %v729_v27, %v698_v30 }
 0x1d0   : > { %v1082_v52 = vpop.permute.xlu1 %1081 }
 0x1d1   : > { %v1083_v55 = vrot.slane %v1082_v52, 6 }
 0x1d3   : > { %v1084_v63 = vsel %vm318_vm4, %v1083_v55, %v1082_v52 }
 0x1d4   : > { %v1089_v31 = vpop.permute.xlu2 %1088  ;;  %892 = vrot.lane.b32.xlu2 %v891_v44, %s1825_s29  ;;  %v1086_v1 = vadd.f32 %v1084_v63, %v1053_v62 }
 0x1d5   : > { %v1093_v32 = vperm.slane %v1089_v31, %v1995_v11  ;;  %v939_v31 = vrot.slane %v2221_v28, 2 }
 0x1d7   : > { %v1095_v19 = vmul.f32 %v1093_v32, %v2010_v26  ;;  %v940_v40 = vsel %vm318_vm4, %v2221_v28, %v939_v31 }
 0x1d8   : > { %v1002_v18 = vpop.permute.xlu1 %1001 }
 0x1d9   : > { %1097 = vrot.lane.b32.xlu1 %v1095_v19, %s1796_s24  ;;  %s1290_s24 = scalar_lea.hbm %s2341_s3, %s1406_s18 }
 0x1da   : > { %s1294_s27 = sshll.u32 %s1290_s24, 4  ;;  %s1295_s27 = int_to_ptr.hbm [resolvable:$true] %s1294_s27 }
 0x1db   : > { %s1706_s28 = sshra.s32 %s1295_s27, 4  ;;  %s1707_s28 = int_to_ptr.hbm [resolvable:$true] %s1706_s28 }
 0x1dc   : > { %v857_v46 = vpop.permute.xlu2 %856  ;;  %1149 = vrot.lane.b32.xlu2 %v1148_v2, %s1826_s30  ;;  %s1708_s29 = scalar_lea.hbm %s1707_s28, 8  ;;  %p1713_p9 = scmp.lt.s32.totalorder %s1707_s28, %s2341_s3 }
 0x1dd   : > { %v858_v47 = vrot.slane %v857_v46, 6  ;;  %p1709_p1 = scmp.ne.s32.totalorder %s1707_s28, %s1708_s29 }
 0x1df   : > { %v859_v49 = vsel %vm352_vm5, %v858_v47, %v857_v46  ;;  %v1003_v46 = vrot.slane %v1002_v18, 6  ;;  %p1710_p4 = pnand %p1709_p1, %p1918_p3 }
 0x1e0   : > { %v861_v50 = vadd.f32 %v859_v49, %v829_v23 }
 0x1e1   : > { %v1004_v52 = vsel %vm385_vm6, %v1003_v46, %v1002_v18  ;;  %p1711_p8 = pneg %p1710_p4 }
 0x1e2   : > { %879 = vrot.lane.b32.xlu0 %v861_v50, %s1821_s26  ;;  %v942_v50 = vadd.f32 %v940_v40, %v915_v41 }
 0x1e4   : > { %v1121_v51 = vpop.permute.xlu2 %1120 }
 0x1e5   : > { %v1125_v53 = vperm.slane %v1121_v51, %v1995_v11 }
 0x1e7   : > { %v1127_v33 = vmul.f32 %v1125_v53, %v2010_v26 }
 0x1e9   : > { %1129 = vrot.lane.b32.xlu1 %v1127_v33, %s1799_s25  ;;  %s217_s25 = scalar_lea.vmem [#allocation9], %s1393_s17  ;;  %s1712_s17 = scalar_lea.hbm %s2341_s3, 16 }
 0x1ea   : > { %p1714_p2 = scmp.lt.s32.totalorder %s1712_s17, %s1708_s29 }
 0x1ec   : > { %p1715_p10 = por %p1714_p2, %p1713_p9 }
 0x1ee   : > { %v1114_v6 = vpop.permute.xlu2 %1113  ;;  %p1716_p11 = pnand %p1715_p10, %p1711_p8 }
 0x1ef   : > { %v1115_v58 = vrot.slane %v1114_v6, 6 }
 0x1f1   : > { %v1116_v26 = vsel %vm352_vm5, %v1115_v58, %v1114_v6 }
 0x1f2   : > { %v1118_v7 = vadd.f32 %v1116_v26, %v1086_v1 }
 0x1f4   : > { %1136 = vrot.lane.b32.xlu0 %v1118_v7, %s1821_s26  ;;  %s1292_s26 = sshll.u32 %s217_s25, 4  ;;  %s1293_s26 = int_to_ptr.vmem [resolvable:$true] %s1292_s26 }
 0x1f6   : > { %v970_v8 = vpop.permute.xlu0 %969  ;;  %v1022_v29 = vpop.permute.xlu2 %1021 }
 0x1f7   : > { %v971_v3 = vrot.slane %v970_v8, 6  ;;  %v1023_v33 = vrot.slane %v1022_v29, 6 }
 0x1f9   : > { %v972_v45 = vsel %vm352_vm5, %v971_v3, %v970_v8  ;;  %v1025_v62 = vsel %vm1024_vm10, %v1023_v33, %v1022_v29 }
 0x1fa   : > { %v974_v28 = vadd.f32 %v972_v45, %v942_v50 }
 0x1fc   : > { %v1006_v59 = vadd.f32 %v1004_v52, %v974_v28 }
 0x1fe   : > { %v759_v12 = vpop.permute.xlu0 %758  ;;  %v391_v35 = vpop.permute.xlu2 %390 }
 0x1ff   : > { %v392_v17 = vrot.slane %v391_v35, 2  ;;  %v760_v21 = vrot.slane %v759_v12, 6 }
 0x201   : > { %v394_v4 = vsel %vm393_vm7, %v391_v35, %v392_v17  ;;  %v761_v36 = vsel %vm385_vm6, %v760_v21, %v759_v12 }
 0x202   : > { %v396_v57 = vadd.f32 %v394_v4, %v2105_v5  ;;  %v528_v5 = vrot.slane %v2048_v60, 6  ;;  %v763_v42 = vadd.f32 %v761_v36, %v731_v22 }
 0x204   : > { %v2255_v32 = vmul.f32 %v408_v24, %v396_v57  ;;  %v530_v49 = vsel %vm529_vm9, %v528_v5, %v2048_v60 }
 0x206   : > { %v766_v37 = vpop.permute.xlu0 %765  ;;  %v514_v19 = vpop.permute.xlu2 %513 }
 0x207   : > { %v767_v38 = vrot.slane %v766_v37, 2  ;;  %v515_v14 = vrot.slane %v514_v19, 2 }
 0x209   : > { %v768_v43 = vsel %vm393_vm7, %v766_v37, %v767_v38  ;;  %v516_v44 = vsel %vm393_vm7, %v514_v19, %v515_v14 }
 0x20a   : > { %v770_v47 = vadd.f32 %v768_v43, %v763_v42  ;;  %v518_v23 = vadd.f32 %v516_v44, %v2137_v48 }
 0x20c   : > { %772 = vrot.lane.b32.xlu1 %v770_v47, %s1827_s5  ;;  %v2268_v51 = vmul.f32 %v530_v49, %v518_v23 }
 0x20e   : > { %v809_v53 = vpop.permute.xlu2 %808  ;;  %v780_v16 = vpop.permute.xlu0 %779 }
 0x20f   : > { %v1009_v54 = vpop.permute.xlu1 %1008  ;;  %v784_v34 = vperm.slane %v780_v16, %v1995_v11  ;;  %v810_v21 = vrot.slane %v809_v53, 2 }
 0x210   : > { %v1010_v55 = vrot.slane %v1009_v54, 2 }
 0x211   : > { %v786_v4 = vmul.f32 %v784_v34, %v1997_v13  ;;  %v811_v57 = vsel %vm318_vm4, %v809_v53, %v810_v21 }
 0x212   : > { %v1011_v61 = vsel %vm393_vm7, %v1009_v54, %v1010_v55 }
 0x213   : > { %v1013_v48 = vadd.f32 %v1011_v61, %v1006_v59  ;;  %v813_v27 = vadd.f32 %v811_v57, %v786_v4 }
 0x215   : > { %v1027_v60 = vmul.f32 %v1025_v62, %v1013_v48 }
 0x216   : > { %v629_v63 = vpop.permute.xlu2 %628 }
 0x217   : > { %1029 = vrot.lane.b32.xlu0 %v1027_v60, %s1828_s6  ;;  %v597_v39 = vpop.permute.xlu1 %596  ;;  %v630_v1 = vrot.slane %v629_v63, 6 }
 0x218   : > { %v598_v0 = vrot.slane %v597_v39, 6 }
 0x219   : > { %v631_v7 = vsel %vm385_vm6, %v630_v1, %v629_v63 }
 0x21a   : > { %v599_v6 = vsel %vm352_vm5, %v598_v0, %v597_v39 }
 0x21b   : > { %v601_v26 = vadd.f32 %v599_v6, %v2145_v56 }
 0x21d   : > { %v633_v9 = vadd.f32 %v631_v7, %v601_v26 }
 0x21e   : > { %v636_v2 = vpop.permute.xlu2 %635 }
 0x21f   : > { %v637_v58 = vrot.slane %v636_v2, 2  ;;  %v1037_v17 = vpop.permute.xlu1 %1036  ;;  %v841_v20 = vpop.permute.xlu0 %840 }
 0x220   : > { %v842_v24 = vrot.slane %v841_v20, 6  ;;  %v1041_v38 = vperm.slane %v1037_v17, %v1995_v11 }
 0x221   : > { %v638_v8 = vsel %vm393_vm7, %v636_v2, %v637_v58 }
 0x222   : > { %v640_v12 = vadd.f32 %v638_v8, %v633_v9  ;;  %v843_v30 = vsel %vm352_vm5, %v842_v24, %v841_v20  ;;  %v1043_v44 = vmul.f32 %v1041_v38, %v1997_v13 }
 0x223   : > { %v845_v22 = vadd.f32 %v843_v30, %v813_v27 }
 0x226   : > { %v649_v29 = vpop.permute.xlu2 %648 }
 0x227   : > { %v650_v10 = vrot.slane %v649_v29, 6  ;;  %v1066_v56 = vpop.permute.xlu1 %1065  ;;  %v873_v25 = vpop.permute.xlu0 %872 }
 0x228   : > { %v874_v31 = vrot.slane %v873_v25, 6  ;;  %v1067_v40 = vrot.slane %v1066_v56, 2 }
 0x229   : > { %v652_v35 = vsel %vm651_vm11, %v650_v10, %v649_v29 }
 0x22a   : > { %v654_v15 = vmul.f32 %v652_v35, %v640_v12  ;;  %v875_v37 = vsel %vm385_vm6, %v874_v31, %v873_v25  ;;  %v1068_v46 = vsel %vm318_vm4, %v1066_v56, %v1067_v40  ;;  %vm1195_vm4 = vcmask 623616  }
 0x22b   : > { %v877_v18 = vadd.f32 %v875_v37, %v845_v22  ;;  %v1070_v49 = vadd.f32 %v1068_v46, %v1043_v44 }
 0x22c   : > { %656 = vrot.lane.b32.xlu1 %v654_v15, %s1827_s5 }
 0x22e   : > { %v893_v36 = vpop.permute.xlu2 %892 }
 0x22f   : > { %v894_v19 = vrot.slane %v893_v36, 6 }
 0x231   : > { %v896_v42 = vsel %vm895_vm12, %v894_v19, %v893_v36 }
 0x236   : > { %v1150_v11 = vpop.permute.xlu2 %1149 }
 0x237   : > { %v1151_v54 = vrot.slane %v1150_v11, 6 }
 0x239   : > { %v1153_v61 = vsel %vm1152_vm13, %v1151_v54, %v1150_v11 }
 0x24b   : > { %v1098_v3 = vpop.permute.xlu1 %1097 }
 0x24c   : > { %v1099_v47 = vrot.slane %v1098_v3, 6 }
 0x24e   : > { %v1100_v50 = vsel %vm352_vm5, %v1099_v47, %v1098_v3  ;;  %vm1180_vm5 = vcmask 1042024  }
 0x24f   : > { %v1102_v52 = vadd.f32 %v1100_v50, %v1070_v49 }
 0x254   : > { %v880_v5 = vpop.permute.xlu0 %879 }
 0x255   : > { %v881_v41 = vrot.slane %v880_v5, 2 }
 0x257   : > { %v882_v14 = vsel %vm393_vm7, %v880_v5, %v881_v41 }
 0x258   : > { %v884_v43 = vadd.f32 %v882_v14, %v877_v18 }
 0x25a   : > { %v898_v45 = vmul.f32 %v896_v42, %v884_v43 }
 0x25b   : > { %v1130_v23 = vpop.permute.xlu1 %1129 }
 0x25c   : > { %900 = vrot.lane.b32.xlu2 %v898_v45, %s1828_s6  ;;  %v1131_v28 = vrot.slane %v1130_v23, 6 }
 0x25e   : > { %v1132_v53 = vsel %vm385_vm6, %v1131_v28, %v1130_v23 }
 0x25f   : > { %v1134_v33 = vadd.f32 %v1132_v53, %v1102_v52 }
 0x266   : > { %v1137_v55 = vpop.permute.xlu0 %1136 }
 0x267   : > { %v1138_v13 = vrot.slane %v1137_v55, 2 }
 0x269   : > { %v1139_v59 = vsel %vm393_vm7, %v1137_v55, %v1138_v13 }
 0x26a   : > { %v1141_v48 = vadd.f32 %v1139_v59, %v1134_v33 }
 0x26c   : > { %v1155_v62 = vmul.f32 %v1153_v61, %v1141_v48 }
 0x26e   : > { %1157 = vrot.lane.b32.xlu0 %v1155_v62, %s1829_s10 }
 0x27e   : > { %v773_v60 = vpop.permute.xlu1 %772 }
 0x27f   : > { %v774_v63 = vrot.slane %v773_v60, 2 }
 0x281   : > { %v775_v39 = vsel %vm659_vm14, %v773_v60, %v774_v63 }
 0x282   : > { %v777_v1 = vadd.f32 %v775_v39, %v2268_v51 }
 0x289   : > { %v1030_v0 = vpop.permute.xlu0 %1029 }
 0x28a   : > { %v1031_v2 = vrot.slane %v1030_v0, 2 }
 0x28c   : > { %v1032_v6 = vsel %vm903_vm15, %v1030_v0, %v1031_v2 }
 0x28d   : > { %v1034_v58 = vadd.f32 %v1032_v6, %v777_v1 }
 0x28f   : > { %1165 = vrot.lane.b32.xlu1 %v1034_v58, %s1830_s11 }
 0x29e   : > { %v657_v26 = vpop.permute.xlu1 %656 }
 0x29f   : > { %v658_v7 = vrot.slane %v657_v26, 2 }
 0x2a1   : > { %v660_v8 = vsel %vm659_vm14, %v657_v26, %v658_v7 }
 0x2a2   : > { %v662_v9 = vadd.f32 %v660_v8, %v2255_v32 }
 0x2b6   : > { %v901_v29 = vpop.permute.xlu2 %900 }
 0x2b7   : > { %v902_v10 = vrot.slane %v901_v29, 2 }
 0x2b9   : > { %v904_v12 = vsel %vm903_vm15, %v901_v29, %v902_v10 }
 0x2ba   : > { %v906_v35 = vadd.f32 %v904_v12, %v662_v9 }
 0x2e0   : > { %v1158_v15 = vpop.permute.xlu0 %1157 }
 0x2e1   : > { %v1159_v16 = vrot.slane %v1158_v15, 2 }
 0x2e3   : > { %v1161_v17 = vsel %vm1160_vm2, %v1158_v15, %v1159_v16 }
 0x2e4   : > { %v1163_v34 = vadd.f32 %v1161_v17, %v906_v35 }
 0x301   : > { %v1166_v20 = vpop.permute.xlu1 %1165 }
 0x302   : > { %v1167_v51 = vrot.slane %v1166_v20, 2 }
 0x304   : > { %v1169_v21 = vsel %vm1168_vm3, %v1166_v20, %v1167_v51  ;;  %vm1273_vm3 = vcmask 416768  }
 0x305   : > { %v1171_v56 = vadd.f32 %v1169_v21, %v1163_v34 }
 0x307   : > { %1173 = vst [vmem:[#allocation1] ss:$4 sm:$0xff] %v1171_v56 }
 0x30e   : > { %v1176_v4 = vld.sshfl [vmem:[#allocation1 + $0x10] sm:$0xff pattern:$0x73625140]  ;;  %v1174_v57 = vld.sshfl [vmem:[#allocation1] sm:$0xff pattern:$0x73625140] }
 0x30f   : > { %v1196_v32 = vsel %vm1195_vm4, %v1176_v4, 0.0  ;;  %v1175_v24 = vld.sshfl [vmem:[#allocation1 + $0x8] sm:$0xff pattern:$0x73625140]  ;;  %v1181_v25 = vsel %vm1180_vm5, %v1174_v57, 0.0 }
 0x310   : > { %v1197_v27 = vrot.slane %v1196_v32, 4  ;;  %v1182_v30 = vrot.slane %v1181_v25, 4  ;;  %v1188_v31 = vsel %vm402_vm0, %v1175_v24, 0.0 }
 0x311   : > { %v1189_v36 = vrot.slane %v1188_v31, 4 }
 0x312   : > { %v1198_v22 = vadd.f32 %v1197_v27, %v1196_v32  ;;  %v1183_v3 = vadd.f32 %v1182_v30, %v1181_v25  ;;  %v1260_v30 = vld [vmem:[%s1954_s21] sm:$0xff] }
 0x313   : > { %v1190_v37 = vadd.f32 %v1189_v36, %v1188_v31 }
 0x314   : > { %v1199_v19 = vrot.slane %v1198_v22, 2  ;;  %v1184_v5 = vrot.slane %v1183_v3, 2 }
 0x315   : > { %v1191_v41 = vrot.slane %v1190_v37, 2 }
 0x316   : > { %v1200_v18 = vadd.f32 %v1199_v19, %v1198_v22  ;;  %v1185_v38 = vadd.f32 %v1184_v5, %v1183_v3 }
 0x317   : > { %v1192_v14 = vadd.f32 %v1191_v41, %v1190_v37 }
 0x318   : > { %v1201_v40 = vrot.slane %v1200_v18, 1  ;;  %v1186_v42 = vrot.slane %v1185_v38, 1 }
 0x319   : > { %v1193_v43 = vrot.slane %v1192_v14, 1 }
 0x31a   : > { %v1202_v44 = vadd.f32 %v1201_v40, %v1200_v18  ;;  %v1187_v45 = vadd.f32 %v1186_v42, %v1185_v38 }
 0x31b   : > { %v1194_v46 = vadd.f32 %v1193_v43, %v1192_v14 }
 0x31c   : > { %v1399_v47 = vmul.f32 -1.442695, %v1202_v44  ;;  %v1397_v23 = vmul.f32 -1.442695, %v1187_v45 }
 0x31d   : > { %v1398_v49 = vmul.f32 -1.442695, %v1194_v46 }
 0x31e   : > { %1590 = vpow2.f32 %v1399_v47 }
 0x31f   : > { %1592 = vpow2.f32 %v1397_v23 }
 0x320   : > { %1594 = vpow2.f32 %v1398_v49 }
 0x324   : > { %v1591_v50 = vpop.eup %1590 }
 0x325   : > { %v1593_v28 = vpop.eup %1592  ;;  %v1214_v52 = vadd.f32 1.0, %v1591_v50 }
 0x326   : > { %v1595_v11 = vpop.eup %1594  ;;  %v1212_v53 = vadd.f32 1.0, %v1593_v28 }
 0x327   : > { %1596 = vrcp.f32 %v1214_v52  ;;  %v1213_v54 = vadd.f32 1.0, %v1595_v11  ;;  %v1256_v62 = vand.u32 2147483648, %v1214_v52  ;;  %v1254_v0 = vand.u32 2147483647, %v1214_v52 }
 0x328   : > { %1598 = vrcp.f32 %v1212_v53  ;;  %vm1250_vm6 = vweird.f32 %v1214_v52  ;;  %vm1220_vm11 = vweird.f32 %v1212_v53  ;;  %v1226_v10 = vand.u32 2147483648, %v1212_v53 }
 0x329   : > { %1600 = vrcp.f32 %v1213_v54  ;;  %v1257_v58 = vor.u32 1.1754944e-38, %v1256_v62  ;;  %v1241_v26 = vand.u32 2147483648, %v1213_v54  ;;  %v1239_v9 = vand.u32 2147483647, %v1213_v54 }
 0x32a   : > { %vm1255_vm10 = vcmp.eq.f32.partialorder %v1254_v0, 8.507059e+37  ;;  %v1224_v15 = vand.u32 2147483647, %v1212_v53  ;;  %vm1235_vm13 = vweird.f32 %v1213_v54  ;;  %v1227_v34 = vor.u32 1.1754944e-38, %v1226_v10 }
 0x32b   : > { %v1242_v17 = vor.u32 1.1754944e-38, %v1241_v26  ;;  %vm1240_vm15 = vcmp.eq.f32.partialorder %v1239_v9, 8.507059e+37 }
 0x32c   : > { %vm1225_vm2 = vcmp.eq.f32.partialorder %v1224_v15, 8.507059e+37 }
 0x32d   : > { %v1597_v33 = vpop.eup %1596 }
 0x32e   : > { %v1599_v55 = vpop.eup %1598  ;;  %v1246_v13 = vmul.f32 %v1597_v33, %v1214_v52  ;;  %vm1251_vm0 = vweird.f32 %v1597_v33 }
 0x32f   : > { %v1216_v59 = vmul.f32 %v1599_v55, %v1212_v53  ;;  %v1601_v61 = vpop.eup %1600  ;;  %vm1221_vm7 = vweird.f32 %v1599_v55  ;;  %vm1252_vm8 = vmor %vm1250_vm6, %vm1251_vm0 }
 0x330   : > { %v1247_v48 = vsub.f32 1.0, %v1246_v13  ;;  %v1231_v63 = vmul.f32 %v1601_v61, %v1213_v54  ;;  %vm1236_vm9 = vweird.f32 %v1601_v61  ;;  %vm2294_vm12 = vmor %vm1220_vm11, %vm1221_vm7 }
 0x331   : > { %v1217_v60 = vsub.f32 1.0, %v1216_v59  ;;  %vm1237_vm14 = vmor %vm1235_vm13, %vm1236_vm9 }
 0x332   : > { %v1248_v39 = vmul.f32 %v1597_v33, %v1247_v48  ;;  %v1232_v1 = vsub.f32 1.0, %v1231_v63 }
 0x333   : > { %v1218_v2 = vmul.f32 %v1599_v55, %v1217_v60 }
 0x334   : > { %v1249_v6 = vadd.f32 %v1597_v33, %v1248_v39  ;;  %v1233_v8 = vmul.f32 %v1601_v61, %v1232_v1 }
 0x335   : > { %v1219_v7 = vadd.f32 %v1599_v55, %v1218_v2 }
 0x336   : > { %v1253_v29 = vsel %vm1252_vm8, %v1597_v33, %v1249_v6  ;;  %v1234_v16 = vadd.f32 %v1601_v61, %v1233_v8 }
 0x337   : > { %v1258_v12 = vsel %vm1255_vm10, %v1257_v58, %v1253_v29  ;;  %v1223_v20 = vsel %vm2294_vm12, %v1599_v55, %v1219_v7 }
 0x338   : > { %1268 = vrot.lane.b32.xlu0 %v1258_v12, %s1831_s20  ;;  %v1238_v51 = vsel %vm1237_vm14, %v1601_v61, %v1234_v16  ;;  %v1228_v4 = vsel %vm1225_vm2, %v1227_v34, %v1223_v20 }
 0x339   : > { %v1243_v21 = vsel %vm1240_vm15, %v1242_v17, %v1238_v51 }
 0x33a   : > { %v1264_v56 = vrot.slane %v1243_v21, 4 }
 0x33c   : > { %v1265_v57 = vsel %vm227_vm1, %v1228_v4, %v1264_v56 }
 0x33d   : > { %1266 = vrot.lane.b32.xlu2 %v1265_v57, %s1831_s20 }
 0x397   : > { %v1267_v32 = vpop.permute.xlu2 %1266 }
 0x398   : > { %v1270_v25 = vrot.slane %v1267_v32, 4 }
 0x3aa   : > { %v1269_v24 = vpop.permute.xlu0 %1268 }
 0x3ab   : > { %v1271_v27 = vrot.slane %v1269_v24, 4 }
 0x3ad   : > { %v1272_v31 = vsel %vm227_vm1, %v1270_v25, %v1271_v27 }
 0x3ae   : > { %v1274_v36 = vsel %vm1273_vm3, %v1267_v32, %v1272_v31 }
 0x3af   : > { %v1276_v22 = vmul.f32 %v1274_v36, %v1260_v30 }
 0x3b1   : > { %1277 = vst [vmem:[%s217_s25] sm:$0xff] %v1276_v22 }
 0x3b2   : > { %1719 = shalt.err (!%p1716_p11)
}
 0x3b3   : > { %1417 = dma.vmem_to_hbm [thread:$0]  (%p1918_p3), %s1293_s26, 128, %s1295_s27, %s1279_s16  }
 0x3b4 PF: > { %s1306_s9 = sand.u32 1, %s1750_s12   ;;  %p2349_p12 = scmp.ge.s32.totalorder %s1762_s15, 2 }
 0x3b5   : > { %s1307_s10 = scalar_lea.sflag [#allocation5], %s1306_s9 }
 0x3b6   : > { %p1431_p13 = pnand %p2349_p12, %p1887_p6 }
 0x3b8   : > { %p1432_p0 = pneg %p1431_p13 }
 0x3ba   : > { %1745 = dma.done.wait (%p1432_p0), %s1307_s10, 128  }
 0x3bb   : > { %1747 = vsyncadd (%p1432_p0), %s1307_s10, 4294967168  ;;  %p17_p5 = scmp.ge.s32.totalorder %s1908_s4, 4   ;;  %s2350_s12 = smov %s1754_s13 }
 0x3bc   : > { %s2351_s13 = smov %s1758_s14  ;;  %s2352_s14 = smov %s1924_s8 }
 0x3bd   : > { %s2353_s15 = smov %s1908_s4  ;;  %19 = sbr.rel (!%p17_p5) target bundleno = 6 (0x6), region = 92 }
 0x3c2   :  { %1313 = vsyncpa [#allocation4], 1 }
 0x3c3   :  { %1315 = vsyncpa [#allocation4 + $0x1], 1 }
 0x3c4   :  { %1316 = vsyncpa [#allocation7], 1 }
 0x3c5   :  { %1317 = vsyncpa [#allocation5], 1 }
 0x3c6   :  { %1319 = vsyncpa [#allocation5 + $0x1], 1 }

</bundles_post_ra>
